<compile_context>
chip_gen: v7x
topology: tpu7x:2x2x1
jax: 0.10.0
libtpu: 0.0.40
codegen_flags: <defaults>
</compile_context>

<pallas_src>
import jax
import jax.numpy as jnp
from jax.experimental import pallas as pl
from jax.experimental.pallas import tpu as pltpu


def relu_conv1x1_kernel(x_ref, w_ref, o_ref):
    # x_ref: (C_in, P) = (C_in, H*W); w_ref: (C_out, C_in); o_ref: (C_out, P)
    x = jnp.maximum(x_ref[...], jnp.zeros((), dtype=x_ref.dtype))  # fused ReLU
    o_ref[...] = jnp.dot(
        w_ref[...], x, preferred_element_type=jnp.float32
    ).astype(o_ref.dtype)


def relu_conv1x1(x_nchw, weight_oihw):
    """x_nchw: (N, C_in, H, W) float32
       weight_oihw: (C_out, C_in, 1, 1) float32 (Conv2d weight, bias=False)
       returns (N, C_out, H, W) float32"""
    N, C_in, H, W = x_nchw.shape
    C_out = weight_oihw.shape[0]
    P = H * W

    # NCHW-native: these reshapes are free (no data movement, no transposes).
    x3d = x_nchw.reshape(N, C_in, P)          # (N, K, P)
    w2d = weight_oihw.reshape(C_out, C_in)    # (C_out, K) already correct orientation

    # Untiled per-batch blocks: total VMEM footprint ~1.2 MB (well under scoped VMEM
    # on v5e/v6e/v7x), so a single grid step per batch element is the right choice
    # at this problem size — no K/M tiling, no vmem_limit_bytes needed.
    out3d = pl.pallas_call(
        relu_conv1x1_kernel,
        out_shape=jax.ShapeDtypeStruct((N, C_out, P), x_nchw.dtype),
        grid=(N,),
        in_specs=[
            pl.BlockSpec((None, C_in, P), lambda n: (n, 0, 0)),   # batch dim squeezed
            pl.BlockSpec((C_out, C_in), lambda n: (0, 0)),
        ],
        out_specs=pl.BlockSpec((None, C_out, P), lambda n: (n, 0, 0)),
        compiler_params=pltpu.CompilerParams(
            dimension_semantics=("parallel",)   # independent per-batch blocks
        ),
    )(x3d, w2d)

    return out3d.reshape(N, C_out, H, W)


if __name__ == "__main__":
    key = jax.random.PRNGKey(0)
    kx, kw = jax.random.split(key)

    # Shapes implied by the module: x275 ~ (1, 864, 14, 14), conv 864 -> 128, 1x1, no bias.
    N, C_in, H, W, C_out = 1, 864, 14, 14, 128
    x = jax.random.normal(kx, (N, C_in, H, W), dtype=jnp.float32)

    # Deterministic weight init (kaiming-uniform-like bound, as PyTorch Conv2d default).
    fan_in = C_in * 1 * 1
    bound = (1.0 / fan_in) ** 0.5
    weight = jax.random.uniform(
        kw, (C_out, C_in, 1, 1), minval=-bound, maxval=bound, dtype=jnp.float32
    )

    out = relu_conv1x1(x, weight)
    jax.block_until_ready(out)

    # sanity check against pure-JAX reference
    ref = jnp.einsum(
        "nchw,oc->nohw", jnp.maximum(x, 0.0), weight.reshape(C_out, C_in)
    )
    assert out.shape == (N, C_out, H, W)
    assert jnp.allclose(out, ref, atol=1e-4, rtol=1e-4)

    print("KERNEL_OK")
</pallas_src>

<mosaic_0001>
module attributes {stable_mosaic.version = 11 : i64} {
  func.func @relu_conv1x1_kernel(%arg0: i32, %arg1: memref<1x864x196xf32, #tpu.memory_space<vmem>>, %arg2: memref<128x864xf32, #tpu.memory_space<vmem>>, %arg3: memref<1x128x196xf32, #tpu.memory_space<vmem>>) attributes {dimension_semantics = [#tpu.dimension_semantics<parallel>], iteration_bounds = array<i64: 1>, scalar_prefetch = 0 : i64, scratch_operands = 0 : i64, tpu.core_type = #tpu.core_type<tc>, window_params = [{transform_indices = @transform_0, window_bounds = array<i64: 1, 864, 196>}, {pipeline_mode = #tpu.pipeline_mode<synchronous>, transform_indices = @transform_1, window_bounds = array<i64: 128, 864>}, {transform_indices = @transform_2, window_bounds = array<i64: 1, 128, 196>}]} {
    %c0 = arith.constant 0 : index
    %c0_0 = arith.constant 0 : index
    %c0_1 = arith.constant 0 : index
    %0 = vector.load %arg1[%c0, %c0_0, %c0_1] : memref<1x864x196xf32, #tpu.memory_space<vmem>>, vector<1x864x196xf32>
    %1 = vector.shape_cast %0 : vector<1x864x196xf32> to vector<864x196xf32>
    %cst = arith.constant 0.000000e+00 : f32
    %2 = vector.broadcast %cst : f32 to vector<864x196xf32>
    %3 = arith.maximumf %1, %2 : vector<864x196xf32>
    %c0_2 = arith.constant 0 : index
    %c0_3 = arith.constant 0 : index
    %4 = vector.load %arg2[%c0_2, %c0_3] : memref<128x864xf32, #tpu.memory_space<vmem>>, vector<128x864xf32>
    %cst_4 = arith.constant dense<0.000000e+00> : vector<128x196xf32>
    %5 = tpu.matmul %4, %3, %cst_4 {dimension_numbers = #tpu.dot_dimension_numbers<[1], [0], [0], [1], [0, 0, 1, 1], [], []>} : vector<128x864xf32>, vector<864x196xf32>, vector<128x196xf32> -> vector<128x196xf32>
    %c0_5 = arith.constant 0 : index
    %c0_6 = arith.constant 0 : index
    %c0_7 = arith.constant 0 : index
    %6 = vector.load %arg3[%c0_5, %c0_6, %c0_7] : memref<1x128x196xf32, #tpu.memory_space<vmem>>, vector<1x128x196xf32>
    %7 = vector.shape_cast %6 : vector<1x128x196xf32> to vector<128x196xf32>
    %8 = vector.shape_cast %5 : vector<128x196xf32> to vector<1x128x196xf32>
    tpu.vector_store %arg3[%c0_5, %c0_6, %c0_7], %8 {strides = array<i32>} : memref<1x128x196xf32, #tpu.memory_space<vmem>>, vector<1x128x196xf32>,
    return
  }
  func.func @transform_0(%arg0: i32) -> (i32, i32, i32) {
    %c0_i32 = arith.constant 0 : i32
    %c0_i32_0 = arith.constant 0 : i32
    %c0_i32_1 = arith.constant 0 : i32
    return %arg0, %c0_i32, %c0_i32_0 : i32, i32, i32
  }
  func.func @transform_1(%arg0: i32) -> (i32, i32) {
    %c0_i32 = arith.constant 0 : i32
    %c0_i32_0 = arith.constant 0 : i32
    %c0_i32_1 = arith.constant 0 : i32
    return %c0_i32, %c0_i32_0 : i32, i32
  }
  func.func @transform_2(%arg0: i32) -> (i32, i32, i32) {
    %c0_i32 = arith.constant 0 : i32
    %c0_i32_0 = arith.constant 0 : i32
    %c0_i32_1 = arith.constant 0 : i32
    return %arg0, %c0_i32, %c0_i32_0 : i32, i32, i32
  }
}

</mosaic_0001>

<bundles_post_ra>
// kernel: tpu_custom_call.1
= control target key start
LH: loop header
LB: loop body
LE: loop exit
PB: predicated region body
PF: predicated region fallthrough
CT: control target
= control target key end

     0   :  { %vm555_vm0 = vcmask 785408   ;;  %vm1249_vm1 = vcmask 556032   ;;  %s2758_s0 = inlined_call_operand.vmem [shape: f32[1,864,196], index: 0, kind: input, shape index: {}]   ;;  %s2759_s1 = inlined_call_operand.vmem [shape: f32[128,864], index: 1, kind: input, shape index: {}]   ;;  %s2760_s2 = inlined_call_operand.vmem [shape: f32[1,128,196], index: 2, kind: output, shape index: {}]  }
   0x1   :  { %v12_v0 = vld [vmem:[%s2758_s0 + $0x8] sm:$0xff]  ;;  %v14_v1 = vld [vmem:[%s2758_s0 + $0x18] sm:$0xff]  ;;  %v11_v7 = vld [vmem:[%s2758_s0] sm:$0xff] }
   0x2   :  { %v140_v2 = vld [vmem:[%s2758_s0 + $0x408] sm:$0xff]  ;;  %v228_v3 = vmax.f32 %v12_v0, 0.0  ;;  %v230_v4 = vmax.f32 %v14_v1, 0.0  ;;  %v142_v5 = vld [vmem:[%s2758_s0 + $0x418] sm:$0xff]  ;;  %v13_v8 = vld [vmem:[%s2758_s0 + $0x10] sm:$0xff]  ;;  %v227_v10 = vmax.f32 %v11_v7, 0.0 }
   0x3   :  { %v356_v6 = vmax.f32 %v140_v2, 0.0  ;;  %v358_v9 = vmax.f32 %v142_v5, 0.0  ;;  %v229_v11 = vmax.f32 %v13_v8, 0.0  ;;  %v139_v12 = vld [vmem:[%s2758_s0 + $0x400] sm:$0xff]  ;;  %v141_v13 = vld [vmem:[%s2758_s0 + $0x410] sm:$0xff]  ;;  %v16_v14 = vld [vmem:[%s2758_s0 + $0x28] sm:$0xff] }
   0x4   :  { %v1301_v15 = vpack.c.bf16 %v230_v4, %v228_v3  ;;  %v355_v16 = vmax.f32 %v139_v12, 0.0  ;;  %v357_v17 = vmax.f32 %v141_v13, 0.0  ;;  %v18_v18 = vld [vmem:[%s2758_s0 + $0x38] sm:$0xff]  ;;  %v232_v19 = vmax.f32 %v16_v14, 0.0  ;;  %v144_v20 = vld [vmem:[%s2758_s0 + $0x428] sm:$0xff]  ;;  %v15_v26 = vld [vmem:[%s2758_s0 + $0x20] sm:$0xff] }
   0x5   :  { %v146_v21 = vld [vmem:[%s2758_s0 + $0x438] sm:$0xff]  ;;  %v1429_v22 = vpack.c.bf16 %v358_v9, %v356_v6  ;;  %v1303_v23 = vpack.c.bf16 %v229_v11, %v227_v10  ;;  %v234_v24 = vmax.f32 %v18_v18, 0.0  ;;  %v360_v25 = vmax.f32 %v144_v20, 0.0  ;;  %v17_v27 = vld [vmem:[%s2758_s0 + $0x30] sm:$0xff]  ;;  %v143_v28 = vld [vmem:[%s2758_s0 + $0x420] sm:$0xff] }
   0x6   :  { %1302 = vmatprep.subr.bf16.mxu1 %v1301_v15  ;;  %v1431_v29 = vpack.c.bf16 %v357_v17, %v355_v16  ;;  %v362_v30 = vmax.f32 %v146_v21, 0.0  ;;  %v231_v31 = vmax.f32 %v15_v26, 0.0  ;;  %v233_v32 = vmax.f32 %v17_v27, 0.0  ;;  %v145_v33 = vld [vmem:[%s2758_s0 + $0x430] sm:$0xff]  ;;  %v20_v34 = vld [vmem:[%s2758_s0 + $0x48] sm:$0xff]  ;;  %v22_v35 = vld [vmem:[%s2758_s0 + $0x58] sm:$0xff] }
   0x7   :  { %1430 = vmatprep.subr.bf16.mxu0 %v1429_v22  ;;  %1304 = vmatpush1.bf16.msra.mxu1 %v1303_v23  ;;  %v1305_v36 = vpack.c.bf16 %v234_v24, %v232_v19  ;;  %v359_v37 = vmax.f32 %v143_v28, 0.0  ;;  %v361_v38 = vmax.f32 %v145_v33, 0.0  ;;  %v236_v39 = vmax.f32 %v20_v34, 0.0  ;;  %v148_v40 = vld [vmem:[%s2758_s0 + $0x448] sm:$0xff]  ;;  %v150_v41 = vld [vmem:[%s2758_s0 + $0x458] sm:$0xff]  ;;  %v19_v42 = vld [vmem:[%s2758_s0 + $0x40] sm:$0xff] }
   0x8   :  { %1432 = vmatpush1.bf16.msra.mxu0 %v1431_v29  ;;  %v1433_v43 = vpack.c.bf16 %v362_v30, %v360_v25  ;;  %v1307_v44 = vpack.c.bf16 %v233_v32, %v231_v31  ;;  %v238_v45 = vmax.f32 %v22_v35, 0.0  ;;  %v364_v46 = vmax.f32 %v148_v40, 0.0  ;;  %v21_v47 = vld [vmem:[%s2758_s0 + $0x50] sm:$0xff]  ;;  %v147_v48 = vld [vmem:[%s2758_s0 + $0x440] sm:$0xff]  ;;  %v24_v54 = vld [vmem:[%s2758_s0 + $0x68] sm:$0xff] }
   0x9   :  { %v149_v49 = vld [vmem:[%s2758_s0 + $0x450] sm:$0xff]  ;;  %1306 = vmatprep.subr.bf16.mxu1 %v1305_v36  ;;  %v1435_v50 = vpack.c.bf16 %v361_v38, %v359_v37  ;;  %v366_v51 = vmax.f32 %v150_v41, 0.0  ;;  %v235_v52 = vmax.f32 %v19_v42, 0.0  ;;  %v237_v53 = vmax.f32 %v21_v47, 0.0  ;;  %v26_v55 = vld [vmem:[%s2758_s0 + $0x78] sm:$0xff]  ;;  %v152_v56 = vld [vmem:[%s2758_s0 + $0x468] sm:$0xff] }
   0xa   :  { %1434 = vmatprep.subr.bf16.mxu0 %v1433_v43  ;;  %v1309_v57 = vpack.c.bf16 %v238_v45, %v236_v39  ;;  %v363_v58 = vmax.f32 %v147_v48, 0.0  ;;  %v365_v59 = vmax.f32 %v149_v49, 0.0  ;;  %v240_v60 = vmax.f32 %v24_v54, 0.0  ;;  %v154_v61 = vld [vmem:[%s2758_s0 + $0x478] sm:$0xff]  ;;  %v23_v62 = vld [vmem:[%s2758_s0 + $0x60] sm:$0xff]  ;;  %v25_v63 = vld [vmem:[%s2758_s0 + $0x70] sm:$0xff] }
   0xb   :  { %1308 = vmatpush1.bf16.msra.mxu1 %v1307_v44  ;;  %v1437_v0 = vpack.c.bf16 %v366_v51, %v364_v46  ;;  %v1311_v1 = vpack.c.bf16 %v237_v53, %v235_v52  ;;  %v242_v2 = vmax.f32 %v26_v55, 0.0  ;;  %v368_v3 = vmax.f32 %v152_v56, 0.0  ;;  %v151_v4 = vld [vmem:[%s2758_s0 + $0x460] sm:$0xff]  ;;  %v153_v5 = vld [vmem:[%s2758_s0 + $0x470] sm:$0xff]  ;;  %v28_v6 = vld [vmem:[%s2758_s0 + $0x88] sm:$0xff] }
   0xc   :  { %1436 = vmatpush1.bf16.msra.mxu0 %v1435_v50  ;;  %1310 = vmatprep.subr.bf16.mxu1 %v1309_v57  ;;  %v1439_v7 = vpack.c.bf16 %v365_v59, %v363_v58  ;;  %v370_v8 = vmax.f32 %v154_v61, 0.0  ;;  %v239_v9 = vmax.f32 %v23_v62, 0.0  ;;  %v241_v10 = vmax.f32 %v25_v63, 0.0  ;;  %v30_v11 = vld [vmem:[%s2758_s0 + $0x98] sm:$0xff]  ;;  %v156_v12 = vld [vmem:[%s2758_s0 + $0x488] sm:$0xff]  ;;  %v27_v18 = vld [vmem:[%s2758_s0 + $0x80] sm:$0xff] }
   0xd   :  { %v158_v13 = vld [vmem:[%s2758_s0 + $0x498] sm:$0xff]  ;;  %1438 = vmatprep.subr.bf16.mxu0 %v1437_v0  ;;  %v1313_v14 = vpack.c.bf16 %v242_v2, %v240_v60  ;;  %v367_v15 = vmax.f32 %v151_v4, 0.0  ;;  %v369_v16 = vmax.f32 %v153_v5, 0.0  ;;  %v244_v17 = vmax.f32 %v28_v6, 0.0  ;;  %v29_v19 = vld [vmem:[%s2758_s0 + $0x90] sm:$0xff]  ;;  %v155_v20 = vld [vmem:[%s2758_s0 + $0x480] sm:$0xff] }
   0xe   :  { %v1441_v21 = vpack.c.bf16 %v370_v8, %v368_v3  ;;  %v1315_v22 = vpack.c.bf16 %v241_v10, %v239_v9  ;;  %v246_v23 = vmax.f32 %v30_v11, 0.0  ;;  %v372_v24 = vmax.f32 %v156_v12, 0.0  ;;  %v157_v25 = vld [vmem:[%s2758_s0 + $0x490] sm:$0xff]  ;;  %v32_v26 = vld [vmem:[%s2758_s0 + $0xa8] sm:$0xff]  ;;  %v34_v27 = vld [vmem:[%s2758_s0 + $0xb8] sm:$0xff] }
   0xf   :  { %1312 = vmatpush1.bf16.msra.mxu1 %v1311_v1  ;;  %v1443_v28 = vpack.c.bf16 %v369_v16, %v367_v15  ;;  %v374_v29 = vmax.f32 %v158_v13, 0.0  ;;  %v243_v30 = vmax.f32 %v27_v18, 0.0  ;;  %v245_v31 = vmax.f32 %v29_v19, 0.0  ;;  %v160_v32 = vld [vmem:[%s2758_s0 + $0x4a8] sm:$0xff]  ;;  %v162_v33 = vld [vmem:[%s2758_s0 + $0x4b8] sm:$0xff]  ;;  %v31_v34 = vld [vmem:[%s2758_s0 + $0xa0] sm:$0xff] }
  0x10   :  { %1440 = vmatpush1.bf16.msra.mxu0 %v1439_v7  ;;  %1314 = vmatprep.subr.bf16.mxu1 %v1313_v14  ;;  %v1317_v35 = vpack.c.bf16 %v246_v23, %v244_v17  ;;  %v371_v36 = vmax.f32 %v155_v20, 0.0  ;;  %v373_v37 = vmax.f32 %v157_v25, 0.0  ;;  %v248_v38 = vmax.f32 %v32_v26, 0.0  ;;  %v33_v39 = vld [vmem:[%s2758_s0 + $0xb0] sm:$0xff]  ;;  %v159_v40 = vld [vmem:[%s2758_s0 + $0x4a0] sm:$0xff]  ;;  %v36_v45 = vld [vmem:[%s2758_s0 + $0xc8] sm:$0xff] }
  0x11   :  { %1442 = vmatprep.subr.bf16.mxu0 %v1441_v21  ;;  %v1445_v41 = vpack.c.bf16 %v374_v29, %v372_v24  ;;  %v250_v42 = vmax.f32 %v34_v27, 0.0  ;;  %v376_v43 = vmax.f32 %v160_v32, 0.0  ;;  %v161_v44 = vld [vmem:[%s2758_s0 + $0x4b0] sm:$0xff]  ;;  %v38_v46 = vld [vmem:[%s2758_s0 + $0xd8] sm:$0xff]  ;;  %v378_v47 = vmax.f32 %v162_v33, 0.0  ;;  %v164_v50 = vld [vmem:[%s2758_s0 + $0x4c8] sm:$0xff] }
  0x12   :  { %v247_v48 = vmax.f32 %v31_v34, 0.0  ;;  %v249_v49 = vmax.f32 %v33_v39, 0.0  ;;  %v166_v51 = vld [vmem:[%s2758_s0 + $0x4d8] sm:$0xff]  ;;  %v1319_v52 = vpack.c.bf16 %v245_v31, %v243_v30  ;;  %v1447_v53 = vpack.c.bf16 %v373_v37, %v371_v36  ;;  %v35_v55 = vld [vmem:[%s2758_s0 + $0xc0] sm:$0xff]  ;;  %v37_v56 = vld [vmem:[%s2758_s0 + $0xd0] sm:$0xff] }
  0x13   :  { %1316 = vmatpush1.bf16.msra.mxu1 %v1315_v22  ;;  %v375_v54 = vmax.f32 %v159_v40, 0.0  ;;  %v163_v57 = vld [vmem:[%s2758_s0 + $0x4c0] sm:$0xff]  ;;  %v1321_v58 = vpack.c.bf16 %v250_v42, %v248_v38  ;;  %v377_v59 = vmax.f32 %v161_v44, 0.0  ;;  %v252_v60 = vmax.f32 %v36_v45, 0.0  ;;  %v165_v62 = vld [vmem:[%s2758_s0 + $0x4d0] sm:$0xff]  ;;  %v40_v63 = vld [vmem:[%s2758_s0 + $0xe8] sm:$0xff] }
  0x14   :  { %1444 = vmatpush1.bf16.msra.mxu0 %v1443_v28  ;;  %1318 = vmatprep.subr.bf16.mxu1 %v1317_v35  ;;  %v254_v61 = vmax.f32 %v38_v46, 0.0  ;;  %v42_v0 = vld [vmem:[%s2758_s0 + $0xf8] sm:$0xff]  ;;  %v1449_v1 = vpack.c.bf16 %v378_v47, %v376_v43  ;;  %v380_v2 = vmax.f32 %v164_v50, 0.0  ;;  %v382_v3 = vmax.f32 %v166_v51, 0.0  ;;  %v168_v7 = vld [vmem:[%s2758_s0 + $0x4e8] sm:$0xff]  ;;  %v39_v13 = vld [vmem:[%s2758_s0 + $0xe0] sm:$0xff] }
  0x15   :  { %1446 = vmatprep.subr.bf16.mxu0 %v1445_v41  ;;  %v1323_v4 = vpack.c.bf16 %v249_v49, %v247_v48  ;;  %v251_v5 = vmax.f32 %v35_v55, 0.0  ;;  %v253_v6 = vmax.f32 %v37_v56, 0.0  ;;  %v170_v8 = vld [vmem:[%s2758_s0 + $0x4f8] sm:$0xff]  ;;  %v379_v9 = vmax.f32 %v163_v57, 0.0  ;;  %v41_v14 = vld [vmem:[%s2758_s0 + $0xf0] sm:$0xff]  ;;  %v167_v17 = vld [vmem:[%s2758_s0 + $0x4e0] sm:$0xff] }
  0x16   :  { %v381_v10 = vmax.f32 %v165_v62, 0.0  ;;  %v256_v11 = vmax.f32 %v40_v63, 0.0  ;;  %v258_v12 = vmax.f32 %v42_v0, 0.0  ;;  %v1451_v15 = vpack.c.bf16 %v377_v59, %v375_v54  ;;  %v169_v21 = vld [vmem:[%s2758_s0 + $0x4f0] sm:$0xff]  ;;  %v44_v22 = vld [vmem:[%s2758_s0 + $0x108] sm:$0xff]  ;;  %v46_v23 = vld [vmem:[%s2758_s0 + $0x118] sm:$0xff] }
  0x17   :  { %1320 = vmatpush1.bf16.msra.mxu1 %v1319_v52  ;;  %v1325_v16 = vpack.c.bf16 %v254_v61, %v252_v60  ;;  %v1453_v18 = vpack.c.bf16 %v382_v3, %v380_v2  ;;  %v384_v19 = vmax.f32 %v168_v7, 0.0  ;;  %v386_v20 = vmax.f32 %v170_v8, 0.0  ;;  %v172_v26 = vld [vmem:[%s2758_s0 + $0x508] sm:$0xff]  ;;  %v174_v27 = vld [vmem:[%s2758_s0 + $0x518] sm:$0xff]  ;;  %v43_v28 = vld [vmem:[%s2758_s0 + $0x100] sm:$0xff] }
  0x18   :  { %1448 = vmatpush1.bf16.msra.mxu0 %v1447_v53  ;;  %1322 = vmatprep.subr.bf16.mxu1 %v1321_v58  ;;  %v255_v24 = vmax.f32 %v39_v13, 0.0  ;;  %v257_v25 = vmax.f32 %v41_v14, 0.0  ;;  %v1327_v29 = vpack.c.bf16 %v253_v6, %v251_v5  ;;  %v1455_v30 = vpack.c.bf16 %v381_v10, %v379_v9  ;;  %v45_v32 = vld [vmem:[%s2758_s0 + $0x110] sm:$0xff]  ;;  %v171_v33 = vld [vmem:[%s2758_s0 + $0x500] sm:$0xff]  ;;  %v48_v39 = vld [vmem:[%s2758_s0 + $0x128] sm:$0xff] }
  0x19   :  { %1450 = vmatprep.subr.bf16.mxu0 %v1449_v1  ;;  %v1329_v31 = vpack.c.bf16 %v258_v12, %v256_v11  ;;  %v173_v34 = vld [vmem:[%s2758_s0 + $0x510] sm:$0xff]  ;;  %v383_v35 = vmax.f32 %v167_v17, 0.0  ;;  %v385_v36 = vmax.f32 %v169_v21, 0.0  ;;  %v260_v37 = vmax.f32 %v44_v22, 0.0  ;;  %v50_v40 = vld [vmem:[%s2758_s0 + $0x138] sm:$0xff]  ;;  %v176_v47 = vld [vmem:[%s2758_s0 + $0x528] sm:$0xff] }
  0x1a   :  { %v262_v38 = vmax.f32 %v46_v23, 0.0  ;;  %v1457_v41 = vpack.c.bf16 %v386_v20, %v384_v19  ;;  %v388_v42 = vmax.f32 %v172_v26, 0.0  ;;  %v390_v43 = vmax.f32 %v174_v27, 0.0  ;;  %v178_v48 = vld [vmem:[%s2758_s0 + $0x538] sm:$0xff]  ;;  %v47_v53 = vld [vmem:[%s2758_s0 + $0x120] sm:$0xff]  ;;  %v49_v54 = vld [vmem:[%s2758_s0 + $0x130] sm:$0xff] }
  0x1b   :  { %1324 = vmatpush1.bf16.msra.mxu1 %v1323_v4  ;;  %v1331_v44 = vpack.c.bf16 %v257_v25, %v255_v24  ;;  %v259_v45 = vmax.f32 %v43_v28, 0.0  ;;  %v261_v46 = vmax.f32 %v45_v32, 0.0  ;;  %v387_v49 = vmax.f32 %v171_v33, 0.0  ;;  %v175_v57 = vld [vmem:[%s2758_s0 + $0x520] sm:$0xff]  ;;  %v177_v61 = vld [vmem:[%s2758_s0 + $0x530] sm:$0xff]  ;;  %v52_v62 = vld [vmem:[%s2758_s0 + $0x148] sm:$0xff] }
  0x1c   :  { %1452 = vmatpush1.bf16.msra.mxu0 %v1451_v15  ;;  %1326 = vmatprep.subr.bf16.mxu1 %v1325_v16  ;;  %v389_v50 = vmax.f32 %v173_v34, 0.0  ;;  %v264_v51 = vmax.f32 %v48_v39, 0.0  ;;  %v266_v52 = vmax.f32 %v50_v40, 0.0  ;;  %v1459_v55 = vpack.c.bf16 %v385_v36, %v383_v35  ;;  %v54_v63 = vld [vmem:[%s2758_s0 + $0x158] sm:$0xff]  ;;  %v180_v2 = vld [vmem:[%s2758_s0 + $0x548] sm:$0xff]  ;;  %v51_v4 = vld [vmem:[%s2758_s0 + $0x140] sm:$0xff] }
  0x1d   :  { %1454 = vmatprep.subr.bf16.mxu0 %v1453_v18  ;;  %v1333_v56 = vpack.c.bf16 %v262_v38, %v260_v37  ;;  %v1461_v58 = vpack.c.bf16 %v390_v43, %v388_v42  ;;  %v392_v59 = vmax.f32 %v176_v47, 0.0  ;;  %v394_v60 = vmax.f32 %v178_v48, 0.0  ;;  %v182_v3 = vld [vmem:[%s2758_s0 + $0x558] sm:$0xff]  ;;  %v53_v8 = vld [vmem:[%s2758_s0 + $0x150] sm:$0xff]  ;;  %v179_v9 = vld [vmem:[%s2758_s0 + $0x540] sm:$0xff] }
  0x1e   :  { %v263_v0 = vmax.f32 %v47_v53, 0.0  ;;  %v265_v1 = vmax.f32 %v49_v54, 0.0  ;;  %v1335_v5 = vpack.c.bf16 %v261_v46, %v259_v45  ;;  %v1463_v6 = vpack.c.bf16 %v389_v50, %v387_v49  ;;  %v181_v10 = vld [vmem:[%s2758_s0 + $0x550] sm:$0xff]  ;;  %v56_v15 = vld [vmem:[%s2758_s0 + $0x168] sm:$0xff]  ;;  %v58_v16 = vld [vmem:[%s2758_s0 + $0x178] sm:$0xff] }
  0x1f   :  { %1328 = vmatpush1.bf16.msra.mxu1 %v1327_v29  ;;  %v1337_v7 = vpack.c.bf16 %v266_v52, %v264_v51  ;;  %v391_v11 = vmax.f32 %v175_v57, 0.0  ;;  %v393_v12 = vmax.f32 %v177_v61, 0.0  ;;  %v268_v13 = vmax.f32 %v52_v62, 0.0  ;;  %v184_v23 = vld [vmem:[%s2758_s0 + $0x568] sm:$0xff]  ;;  %v186_v24 = vld [vmem:[%s2758_s0 + $0x578] sm:$0xff]  ;;  %v55_v29 = vld [vmem:[%s2758_s0 + $0x160] sm:$0xff] }
  0x20   :  { %1456 = vmatpush1.bf16.msra.mxu0 %v1455_v30  ;;  %1330 = vmatprep.subr.bf16.mxu1 %v1329_v31  ;;  %v270_v14 = vmax.f32 %v54_v63, 0.0  ;;  %v1465_v17 = vpack.c.bf16 %v394_v60, %v392_v59  ;;  %v396_v18 = vmax.f32 %v180_v2, 0.0  ;;  %v398_v19 = vmax.f32 %v182_v3, 0.0  ;;  %v57_v30 = vld [vmem:[%s2758_s0 + $0x170] sm:$0xff]  ;;  %v183_v33 = vld [vmem:[%s2758_s0 + $0x560] sm:$0xff]  ;;  %v60_v35 = vld [vmem:[%s2758_s0 + $0x188] sm:$0xff] }
  0x21   :  { %1458 = vmatprep.subr.bf16.mxu0 %v1457_v41  ;;  %v1339_v20 = vpack.c.bf16 %v265_v1, %v263_v0  ;;  %v267_v21 = vmax.f32 %v51_v4, 0.0  ;;  %v269_v22 = vmax.f32 %v53_v8, 0.0  ;;  %v395_v25 = vmax.f32 %v179_v9, 0.0  ;;  %v185_v34 = vld [vmem:[%s2758_s0 + $0x570] sm:$0xff]  ;;  %v62_v39 = vld [vmem:[%s2758_s0 + $0x198] sm:$0xff]  ;;  %v188_v40 = vld [vmem:[%s2758_s0 + $0x588] sm:$0xff] }
  0x22   :  { %v397_v26 = vmax.f32 %v181_v10, 0.0  ;;  %v272_v27 = vmax.f32 %v56_v15, 0.0  ;;  %v274_v28 = vmax.f32 %v58_v16, 0.0  ;;  %v1467_v31 = vpack.c.bf16 %v393_v12, %v391_v11  ;;  %v190_v41 = vld [vmem:[%s2758_s0 + $0x598] sm:$0xff]  ;;  %v61_v45 = vld [vmem:[%s2758_s0 + $0x190] sm:$0xff]  ;;  %v187_v46 = vld [vmem:[%s2758_s0 + $0x580] sm:$0xff] }
  0x23   :  { %1332 = vmatpush1.bf16.msra.mxu1 %v1331_v44  ;;  %v1341_v32 = vpack.c.bf16 %v270_v14, %v268_v13  ;;  %v1469_v36 = vpack.c.bf16 %v398_v19, %v396_v18  ;;  %v400_v37 = vmax.f32 %v184_v23, 0.0  ;;  %v402_v38 = vmax.f32 %v186_v24, 0.0  ;;  %v59_v44 = vld [vmem:[%s2758_s0 + $0x180] sm:$0xff]  ;;  %v189_v50 = vld [vmem:[%s2758_s0 + $0x590] sm:$0xff]  ;;  %v64_v51 = vld [vmem:[%s2758_s0 + $0x1a8] sm:$0xff] }
  0x24   :  { %1460 = vmatpush1.bf16.msra.mxu0 %v1459_v55  ;;  %1334 = vmatprep.subr.bf16.mxu1 %v1333_v56  ;;  %v271_v42 = vmax.f32 %v55_v29, 0.0  ;;  %v273_v43 = vmax.f32 %v57_v30, 0.0  ;;  %v1343_v47 = vpack.c.bf16 %v269_v22, %v267_v21  ;;  %v1471_v48 = vpack.c.bf16 %v397_v26, %v395_v25  ;;  %v444_v52 = vld [vmem:[%s2759_s1 + $0x8] sm:$0xff]  ;;  %v66_v57 = vld [vmem:[%s2758_s0 + $0x1b8] sm:$0xff]  ;;  %v65_v8 = vld [vmem:[%s2758_s0 + $0x1b0] sm:$0xff] }
  0x25   :  { %1462 = vmatprep.subr.bf16.mxu0 %v1461_v58  ;;  %v1345_v49 = vpack.c.bf16 %v274_v28, %v272_v27  ;;  %v399_v53 = vmax.f32 %v183_v33, 0.0  ;;  %v401_v54 = vmax.f32 %v185_v34, 0.0  ;;  %v276_v55 = vmax.f32 %v60_v35, 0.0  ;;  %v448_v58 = vld [vmem:[%s2759_s1 + $0x28] sm:$0xff]  ;;  %668 = vmatprep.mubr.f32.mxu1 %v444_v52  ;;  %v194_v2 = vld [vmem:[%s2758_s0 + $0x5b8] sm:$0xff]  ;;  %v191_v11 = vld [vmem:[%s2758_s0 + $0x5a0] sm:$0xff] }
  0x26   :  { %v278_v56 = vmax.f32 %v62_v39, 0.0  ;;  %v1473_v59 = vpack.c.bf16 %v402_v38, %v400_v37  ;;  %v404_v60 = vmax.f32 %v188_v40, 0.0  ;;  %v406_v61 = vmax.f32 %v190_v41, 0.0  ;;  %v192_v1 = vld [vmem:[%s2758_s0 + $0x5a8] sm:$0xff]  ;;  %990 = vmatprep.mubr.f32.mxu0 %v448_v58  ;;  %v193_v15 = vld [vmem:[%s2758_s0 + $0x5b0] sm:$0xff]  ;;  %v198_v21 = vld [vmem:[%s2758_s0 + $0x5d8] sm:$0xff] }
  0x27   :  { %1336 = vmatpush1.bf16.msra.mxu1 %v1335_v5  ;;  %v1347_v62 = vpack.c.bf16 %v273_v43, %v271_v42  ;;  %v275_v63 = vmax.f32 %v59_v44, 0.0  ;;  %v277_v0 = vmax.f32 %v61_v45, 0.0  ;;  %v403_v3 = vmax.f32 %v187_v46, 0.0  ;;  %v68_v16 = vld [vmem:[%s2758_s0 + $0x1c8] sm:$0xff]  ;;  %v67_v22 = vld [vmem:[%s2758_s0 + $0x1c0] sm:$0xff]  ;;  %v69_v26 = vld [vmem:[%s2758_s0 + $0x1d0] sm:$0xff] }
  0x28   :  { %1464 = vmatpush1.bf16.msra.mxu0 %v1463_v6  ;;  %1338 = vmatprep.subr.bf16.mxu1 %v1337_v7  ;;  %v405_v4 = vmax.f32 %v189_v50, 0.0  ;;  %v280_v5 = vmax.f32 %v64_v51, 0.0  ;;  %v282_v6 = vmax.f32 %v66_v57, 0.0  ;;  %v63_v7 = vld [vmem:[%s2758_s0 + $0x1a0] sm:$0xff]  ;;  %v1475_v9 = vpack.c.bf16 %v401_v54, %v399_v53  ;;  %v197_v28 = vld [vmem:[%s2758_s0 + $0x5d0] sm:$0xff]  ;;  %v72_v33 = vld [vmem:[%s2758_s0 + $0x1e8] sm:$0xff] }
  0x29   :  { %1466 = vmatprep.subr.bf16.mxu0 %v1465_v17  ;;  %v1349_v10 = vpack.c.bf16 %v278_v56, %v276_v55  ;;  %v1477_v12 = vpack.c.bf16 %v406_v61, %v404_v60  ;;  %v408_v13 = vmax.f32 %v192_v1, 0.0  ;;  %v410_v14 = vmax.f32 %v194_v2, 0.0  ;;  %v70_v17 = vld [vmem:[%s2758_s0 + $0x1d8] sm:$0xff]  ;;  %v195_v27 = vld [vmem:[%s2758_s0 + $0x5c0] sm:$0xff]  ;;  %v200_v41 = vld [vmem:[%s2758_s0 + $0x5e8] sm:$0xff] }
  0x2a   :  { %v279_v18 = vmax.f32 %v63_v7, 0.0  ;;  %v281_v19 = vmax.f32 %v65_v8, 0.0  ;;  %v1351_v23 = vpack.c.bf16 %v277_v0, %v275_v63  ;;  %v1479_v24 = vpack.c.bf16 %v405_v4, %v403_v3  ;;  %v74_v34 = vld [vmem:[%s2758_s0 + $0x1f8] sm:$0xff]  ;;  %v73_v50 = vld [vmem:[%s2758_s0 + $0x1f0] sm:$0xff]  ;;  %v199_v51 = vld [vmem:[%s2758_s0 + $0x5e0] sm:$0xff] }
  0x2b   :  { %1340 = vmatpush1.bf16.msra.mxu1 %v1339_v20  ;;  %v196_v20 = vld [vmem:[%s2758_s0 + $0x5c8] sm:$0xff]  ;;  %v1353_v25 = vpack.c.bf16 %v282_v6, %v280_v5  ;;  %v407_v29 = vmax.f32 %v191_v11, 0.0  ;;  %v409_v30 = vmax.f32 %v193_v15, 0.0  ;;  %v1481_v35 = vpack.c.bf16 %v410_v14, %v408_v13  ;;  %v202_v42 = vld [vmem:[%s2758_s0 + $0x5f8] sm:$0xff]  ;;  %v201_v55 = vld [vmem:[%s2758_s0 + $0x5f0] sm:$0xff] }
  0x2c   :  { %1468 = vmatpush1.bf16.msra.mxu0 %v1467_v31  ;;  %1342 = vmatprep.subr.bf16.mxu1 %v1341_v32  ;;  %v284_v31 = vmax.f32 %v68_v16, 0.0  ;;  %v286_v32 = vmax.f32 %v70_v17, 0.0  ;;  %v414_v37 = vmax.f32 %v198_v21, 0.0  ;;  %v1355_v38 = vpack.c.bf16 %v281_v19, %v279_v18  ;;  %v76_v56 = vld [vmem:[%s2758_s0 + $0x208] sm:$0xff]  ;;  %v78_v57 = vld [vmem:[%s2758_s0 + $0x218] sm:$0xff]  ;;  %v75_v5 = vld [vmem:[%s2758_s0 + $0x200] sm:$0xff] }
  0x2d   :  { %1470 = vmatprep.subr.bf16.mxu0 %v1469_v36  ;;  %v412_v36 = vmax.f32 %v196_v20, 0.0  ;;  %v283_v39 = vmax.f32 %v67_v22, 0.0  ;;  %v285_v40 = vmax.f32 %v69_v26, 0.0  ;;  %v411_v43 = vmax.f32 %v195_v27, 0.0  ;;  %v206_v60 = vld [vmem:[%s2758_s0 + $0x618] sm:$0xff]  ;;  %v77_v6 = vld [vmem:[%s2758_s0 + $0x210] sm:$0xff] }
  0x2e   :  { %v413_v44 = vmax.f32 %v197_v28, 0.0  ;;  %v288_v45 = vmax.f32 %v72_v33, 0.0  ;;  %v290_v46 = vmax.f32 %v74_v34, 0.0  ;;  %v416_v53 = vmax.f32 %v200_v41, 0.0  ;;  %v205_v11 = vld [vmem:[%s2758_s0 + $0x610] sm:$0xff]  ;;  %v82_v13 = vld [vmem:[%s2758_s0 + $0x238] sm:$0xff] }
  0x2f   :  { %1344 = vmatpush1.bf16.msra.mxu1 %v1343_v47  ;;  %v1483_v47 = vpack.c.bf16 %v409_v30, %v407_v29  ;;  %v1485_v52 = vpack.c.bf16 %v414_v37, %v412_v36  ;;  %v418_v54 = vmax.f32 %v202_v42, 0.0  ;;  %v1359_v58 = vpack.c.bf16 %v285_v40, %v283_v39  ;;  %v208_v17 = vld [vmem:[%s2758_s0 + $0x628] sm:$0xff]  ;;  %v210_v18 = vld [vmem:[%s2758_s0 + $0x638] sm:$0xff]  ;;  %v209_v33 = vld [vmem:[%s2758_s0 + $0x630] sm:$0xff] }
  0x30   :  { %1472 = vmatpush1.bf16.msra.mxu0 %v1471_v48  ;;  %1346 = vmatprep.subr.bf16.mxu1 %v1345_v49  ;;  %v1357_v48 = vpack.c.bf16 %v286_v32, %v284_v31  ;;  %v71_v49 = vld [vmem:[%s2758_s0 + $0x1e0] sm:$0xff]  ;;  %v1487_v61 = vpack.c.bf16 %v413_v44, %v411_v43  ;;  %v289_v0 = vmax.f32 %v73_v50, 0.0  ;;  %v415_v1 = vmax.f32 %v199_v51, 0.0  ;;  %v84_v28 = vld [vmem:[%s2758_s0 + $0x248] sm:$0xff]  ;;  %v86_v29 = vld [vmem:[%s2758_s0 + $0x258] sm:$0xff] }
  0x31   :  { %1474 = vmatprep.subr.bf16.mxu0 %v1473_v59  ;;  %v204_v59 = vld [vmem:[%s2758_s0 + $0x608] sm:$0xff]  ;;  %v287_v63 = vmax.f32 %v71_v49, 0.0  ;;  %v417_v2 = vmax.f32 %v201_v55, 0.0  ;;  %v292_v3 = vmax.f32 %v76_v56, 0.0  ;;  %v294_v4 = vmax.f32 %v78_v57, 0.0  ;;  %v207_v32 = vld [vmem:[%s2758_s0 + $0x620] sm:$0xff] }
  0x32   :  { %v1489_v7 = vpack.c.bf16 %v418_v54, %v416_v53  ;;  %v420_v8 = vmax.f32 %v204_v59, 0.0  ;;  %v291_v15 = vmax.f32 %v75_v5, 0.0  ;;  %v293_v16 = vmax.f32 %v77_v6, 0.0  ;;  %v443_v34 = vld [vmem:[%s2759_s1] sm:$0xff]  ;;  %v214_v39 = vld [vmem:[%s2758_s0 + $0x658] sm:$0xff]  ;;  %v85_v44 = vld [vmem:[%s2758_s0 + $0x250] sm:$0xff] }
  0x33   :  { %1348 = vmatpush1.bf16.msra.mxu1 %v1347_v62  ;;  %v1361_v62 = vpack.c.bf16 %v290_v46, %v288_v45  ;;  %v1363_v14 = vpack.c.bf16 %v289_v0, %v287_v63  ;;  %v1491_v19 = vpack.c.bf16 %v417_v2, %v415_v1  ;;  %v1365_v20 = vpack.c.bf16 %v294_v4, %v292_v3  ;;  %v447_v40 = vld [vmem:[%s2759_s1 + $0x20] sm:$0xff]  ;;  %v90_v49 = vld [vmem:[%s2758_s0 + $0x278] sm:$0xff]  ;;  %v213_v57 = vld [vmem:[%s2758_s0 + $0x650] sm:$0xff] }
  0x34   :  { %1476 = vmatpush1.bf16.msra.mxu0 %v1475_v9  ;;  %1350 = vmatprep.subr.bf16.mxu1 %v1349_v10  ;;  %v422_v9 = vmax.f32 %v206_v60, 0.0  ;;  %v203_v10 = vld [vmem:[%s2758_s0 + $0x600] sm:$0xff]  ;;  %v421_v22 = vmax.f32 %v205_v11, 0.0  ;;  %v298_v27 = vmax.f32 %v82_v13, 0.0  ;;  %v424_v30 = vmax.f32 %v208_v17, 0.0  ;;  %v218_v63 = vld [vmem:[%s2758_s0 + $0x678] sm:$0xff] }
  0x35   :  { %1478 = vmatprep.subr.bf16.mxu0 %v1477_v12  ;;  %v80_v12 = vld [vmem:[%s2758_s0 + $0x228] sm:$0xff]  ;;  %v419_v21 = vmax.f32 %v203_v10, 0.0  ;;  %v426_v31 = vmax.f32 %v210_v18, 0.0  ;;  %v300_v42 = vmax.f32 %v84_v28, 0.0  ;;  %v83_v43 = vld [vmem:[%s2758_s0 + $0x240] sm:$0xff]  ;;  %v423_v50 = vmax.f32 %v207_v32, 0.0 }
  0x36   :  { %v296_v26 = vmax.f32 %v80_v12, 0.0  ;;  %v451_v45 = vld [vmem:[%s2759_s1 + $0x40] sm:$0xff]  ;;  %v425_v51 = vmax.f32 %v209_v33, 0.0  ;;  %v430_v55 = vmax.f32 %v214_v39, 0.0  ;;  %v299_v60 = vmax.f32 %v83_v43, 0.0  ;;  %v454_v0 = vld [vmem:[%s2759_s1 + $0x58] sm:$0xff] }
  0x37   :  { %1352 = vmatpush1.bf16.msra.mxu1 %v1351_v23  ;;  %v79_v23 = vld [vmem:[%s2758_s0 + $0x220] sm:$0xff]  ;;  %v1495_v41 = vpack.c.bf16 %v421_v22, %v419_v21  ;;  %v1497_v53 = vpack.c.bf16 %v426_v31, %v424_v30  ;;  %v306_v2 = vmax.f32 %v90_v49, 0.0  ;;  %v89_v4 = vld [vmem:[%s2758_s0 + $0x270] sm:$0xff]  ;;  %v458_v5 = vld [vmem:[%s2759_s1 + $0x78] sm:$0xff]  ;;  %v429_v11 = vmax.f32 %v213_v57, 0.0 }
  0x38   :  { %1480 = vmatpush1.bf16.msra.mxu0 %v1479_v24  ;;  %1354 = vmatprep.subr.bf16.mxu1 %v1353_v25  ;;  %v81_v24 = vld [vmem:[%s2758_s0 + $0x230] sm:$0xff]  ;;  %v1493_v25 = vpack.c.bf16 %v422_v9, %v420_v8  ;;  %v295_v36 = vmax.f32 %v79_v23, 0.0  ;;  %v1369_v46 = vpack.c.bf16 %v298_v27, %v296_v26  ;;  %v211_v56 = vld [vmem:[%s2758_s0 + $0x640] sm:$0xff]  ;;  %v462_v6 = vld [vmem:[%s2759_s1 + $0x98] sm:$0xff]  ;;  %v1499_v8 = vpack.c.bf16 %v425_v51, %v423_v50 }
  0x39   :  { %1482 = vmatprep.subr.bf16.mxu0 %v1481_v35  ;;  %v1367_v35 = vpack.c.bf16 %v293_v16, %v291_v15  ;;  %v297_v37 = vmax.f32 %v81_v24, 0.0  ;;  %v87_v3 = vld [vmem:[%s2758_s0 + $0x260] sm:$0xff]  ;;  %v92_v9 = vld [vmem:[%s2758_s0 + $0x288] sm:$0xff]  ;;  %v427_v10 = vmax.f32 %v211_v56, 0.0  ;;  %v94_v12 = vld [vmem:[%s2758_s0 + $0x298] sm:$0xff]  ;;  %v434_v15 = vmax.f32 %v218_v63, 0.0 }
  0x3a   :  { %v215_v16 = vld [vmem:[%s2758_s0 + $0x660] sm:$0xff]  ;;  %v217_v17 = vld [vmem:[%s2758_s0 + $0x670] sm:$0xff]  ;;  %v305_v21 = vmax.f32 %v89_v4, 0.0  ;;  %v308_v24 = vmax.f32 %v92_v9, 0.0  ;;  %v464_v33 = vld [vmem:[%s2759_s1 + $0xa8] sm:$0xff] }
  0x3b   :  { %1356 = vmatpush1.bf16.msra.mxu1 %v1355_v38  ;;  %v212_v38 = vld [vmem:[%s2758_s0 + $0x648] sm:$0xff]  ;;  %v1371_v59 = vpack.c.bf16 %v297_v37, %v295_v36  ;;  %v457_v18 = vld [vmem:[%s2759_s1 + $0x70] sm:$0xff]  ;;  %v1503_v30 = vpack.c.bf16 %v429_v11, %v427_v10  ;;  %v431_v31 = vmax.f32 %v215_v16, 0.0  ;;  %v433_v32 = vmax.f32 %v217_v17, 0.0  ;;  %v102_v56 = vld [vmem:[%s2758_s0 + $0x2d8] sm:$0xff] }
  0x3c   :  { %1484 = vmatpush1.bf16.msra.mxu0 %v1483_v47  ;;  %1358 = vmatprep.subr.bf16.mxu1 %v1357_v48  ;;  %v302_v47 = vmax.f32 %v86_v29, 0.0  ;;  %v88_v48 = vld [vmem:[%s2758_s0 + $0x268] sm:$0xff]  ;;  %v428_v54 = vmax.f32 %v212_v38, 0.0  ;;  %v461_v22 = vld [vmem:[%s2759_s1 + $0x90] sm:$0xff]  ;;  %v310_v29 = vmax.f32 %v94_v12, 0.0  ;;  %v483_v4 = vld [vmem:[%s2759_s1 + $0x140] sm:$0xff] }
  0x3d   :  { %1486 = vmatprep.subr.bf16.mxu0 %v1485_v52  ;;  %v455_v52 = vld [vmem:[%s2759_s1 + $0x60] sm:$0xff]  ;;  %v304_v1 = vmax.f32 %v88_v48, 0.0  ;;  %v93_v26 = vld [vmem:[%s2758_s0 + $0x290] sm:$0xff]  ;;  %v468_v37 = vld [vmem:[%s2759_s1 + $0xc8] sm:$0xff] }
  0x3e   :  { %v1501_v13 = vpack.c.bf16 %v430_v55, %v428_v54  ;;  %v465_v27 = vld [vmem:[%s2759_s1 + $0xb0] sm:$0xff]  ;;  %v472_v43 = vld [vmem:[%s2759_s1 + $0xe8] sm:$0xff]  ;;  %v1381_v49 = vpack.c.bf16 %v310_v29, %v308_v24  ;;  %v478_v9 = vld [vmem:[%s2759_s1 + $0x118] sm:$0xff] }
  0x3f   :  { %1360 = vmatpush1.bf16.msra.mxu1 %v1359_v58  ;;  %v450_v58 = vld [vmem:[%s2759_s1 + $0x38] sm:$0xff]  ;;  %v1377_v23 = vpack.c.bf16 %v306_v2, %v304_v1  ;;  %v469_v28 = vld [vmem:[%s2759_s1 + $0xd0] sm:$0xff]  ;;  %v476_v48 = vld [vmem:[%s2759_s1 + $0x108] sm:$0xff] }
  0x40   :  { %1488 = vmatpush1.bf16.msra.mxu0 %v1487_v61  ;;  %1362 = vmatprep.subr.bf16.mxu1 %v1361_v62  ;;  %v301_v61 = vmax.f32 %v85_v44, 0.0  ;;  %v216_v62 = vld [vmem:[%s2758_s0 + $0x668] sm:$0xff]  ;;  %v95_v44 = vld [vmem:[%s2758_s0 + $0x2a0] sm:$0xff]  ;;  %v221_v54 = vld [vmem:[%s2758_s0 + $0x690] sm:$0xff] }
  0x41   :  { %1490 = vmatprep.subr.bf16.mxu0 %v1489_v7  ;;  %v1373_v7 = vpack.c.bf16 %v302_v47, %v300_v42  ;;  %v222_v42 = vld [vmem:[%s2758_s0 + $0x698] sm:$0xff]  ;;  %v100_v55 = vld [vmem:[%s2758_s0 + $0x2c8] sm:$0xff]  ;;  %v99_v1 = vld [vmem:[%s2758_s0 + $0x2c0] sm:$0xff] }
  0x42   :  { %v438_v47 = vmax.f32 %v222_v42, 0.0  ;;  %v101_v2 = vld [vmem:[%s2758_s0 + $0x2d0] sm:$0xff]  ;;  %v104_v10 = vld [vmem:[%s2758_s0 + $0x2e8] sm:$0xff]  ;;  %v106_v11 = vld [vmem:[%s2758_s0 + $0x2f8] sm:$0xff] }
  0x43   :  { %1364 = vmatpush1.bf16.msra.mxu1 %v1363_v14  ;;  %v432_v14 = vmax.f32 %v216_v62, 0.0  ;;  %v311_v62 = vmax.f32 %v95_v44, 0.0  ;;  %v482_v12 = vld [vmem:[%s2759_s1 + $0x138] sm:$0xff]  ;;  %v317_v16 = vmax.f32 %v101_v2, 0.0  ;;  %v224_v17 = vld [vmem:[%s2758_s0 + $0x6a8] sm:$0xff]  ;;  %v320_v24 = vmax.f32 %v104_v10, 0.0 }
  0x44   :  { %1492 = vmatpush1.bf16.msra.mxu0 %v1491_v19  ;;  %1366 = vmatprep.subr.bf16.mxu1 %v1365_v20  ;;  %v1375_v19 = vpack.c.bf16 %v301_v61, %v299_v60  ;;  %v303_v20 = vmax.f32 %v87_v3, 0.0  ;;  %v471_v60 = vld [vmem:[%s2759_s1 + $0xe0] sm:$0xff]  ;;  %v108_v29 = vld [vmem:[%s2758_s0 + $0x308] sm:$0xff]  ;;  %v493_v42 = vld [vmem:[%s2759_s1 + $0x190] sm:$0xff] }
  0x45   :  { %1494 = vmatprep.subr.bf16.mxu0 %v1493_v25  ;;  %v91_v25 = vld [vmem:[%s2758_s0 + $0x280] sm:$0xff]  ;;  %v1505_v36 = vpack.c.bf16 %v434_v15, %v432_v14  ;;  %v486_v14 = vld [vmem:[%s2759_s1 + $0x158] sm:$0xff]  ;;  %v315_v15 = vmax.f32 %v99_v1, 0.0 }
  0x46   :  { %669 = vmatmul.mubr.f32.vlgmr.msra.gmra.mrb[0].mxu1 %v443_v34  ;;  %v96_v34 = vld [vmem:[%s2758_s0 + $0x2a8] sm:$0xff]  ;;  %v1379_v38 = vpack.c.bf16 %v305_v21, %v303_v20  ;;  %v307_v39 = vmax.f32 %v91_v25, 0.0  ;;  %v479_v3 = vld [vmem:[%s2759_s1 + $0x120] sm:$0xff]  ;;  %v226_v20 = vld [vmem:[%s2758_s0 + $0x6b8] sm:$0xff]  ;;  %v440_v21 = vmax.f32 %v224_v17, 0.0  ;;  %v322_v25 = vmax.f32 %v106_v11, 0.0 }
  0x47   :  { %991 = vmatmul.mubr.f32.vlgmr.msra.gmra.mrb[0].mxu0 %v447_v40  ;;  %1368 = vmatpush1.bf16.msra.mxu1 %v1367_v35  ;;  %v98_v35 = vld [vmem:[%s2758_s0 + $0x2b8] sm:$0xff]  ;;  %v309_v40 = vmax.f32 %v93_v26, 0.0  ;;  %v312_v50 = vmax.f32 %v96_v34, 0.0  ;;  %v442_v26 = vmax.f32 %v226_v20, 0.0  ;;  %v1391_v34 = vpack.c.bf16 %v317_v16, %v315_v15  ;;  %v120_v11 = vld [vmem:[%s2758_s0 + $0x368] sm:$0xff] }
  0x48   :  { %1496 = vmatpush1.bf16.msra.mxu0 %v1495_v41  ;;  %674 = vmatprep.mubr.f32.mxu1 %v451_v45  ;;  %v220_v41 = vld [vmem:[%s2758_s0 + $0x688] sm:$0xff]  ;;  %v97_v45 = vld [vmem:[%s2758_s0 + $0x2b0] sm:$0xff]  ;;  %v314_v51 = vmax.f32 %v98_v35, 0.0  ;;  %v1393_v44 = vpack.c.bf16 %v322_v25, %v320_v24  ;;  %v510_v17 = vld [vmem:[%s2759_s1 + $0x218] sm:$0xff] }
  0x49   :  { %996 = vmatprep.mubr.f32.mxu0 %v455_v52  ;;  %1370 = vmatprep.subr.bf16.mxu1 %v1369_v46  ;;  %v436_v46 = vmax.f32 %v220_v41, 0.0  ;;  %v1507_v52 = vpack.c.bf16 %v433_v32, %v431_v31  ;;  %v1383_v61 = vpack.c.bf16 %v309_v40, %v307_v39  ;;  %v313_v63 = vmax.f32 %v97_v45, 0.0  ;;  %v107_v39 = vld [vmem:[%s2758_s0 + $0x300] sm:$0xff]  ;;  %v109_v40 = vld [vmem:[%s2758_s0 + $0x310] sm:$0xff]  ;;  %v514_v20 = vld [vmem:[%s2759_s1 + $0x238] sm:$0xff] }
  0x4a   :  { %675 = vmatmul.mubr.f32.gmra.mrb[2].mxu1 %v450_v58  ;;  %1498 = vmatprep.subr.bf16.mxu0 %v1497_v53  ;;  %v219_v53 = vld [vmem:[%s2758_s0 + $0x680] sm:$0xff]  ;;  %v324_v45 = vmax.f32 %v108_v29, 0.0  ;;  %v124_v25 = vld [vmem:[%s2758_s0 + $0x388] sm:$0xff] }
  0x4b   :  { %997 = vmatmul.mubr.f32.gmra.mrb[2].mxu0 %v454_v0  ;;  %1372 = vmatpush1.bf16.msra.mxu1 %v1371_v59  ;;  %v1509_v57 = vpack.c.bf16 %v438_v47, %v436_v46  ;;  %v435_v58 = vmax.f32 %v219_v53, 0.0  ;;  %v437_v59 = vmax.f32 %v221_v54, 0.0  ;;  %v475_v0 = vld [vmem:[%s2759_s1 + $0x100] sm:$0xff]  ;;  %v112_v47 = vld [vmem:[%s2758_s0 + $0x328] sm:$0xff] }
  0x4c   :  { %680 = vmatprep.mubr.f32.mxu1 %v458_v5  ;;  %1002 = vmatprep.mubr.f32.mxu0 %v462_v6  ;;  %v1385_v5 = vpack.c.bf16 %v314_v51, %v312_v50  ;;  %v316_v6 = vmax.f32 %v100_v55, 0.0  ;;  %v323_v51 = vmax.f32 %v107_v39, 0.0  ;;  %v496_v53 = vld [vmem:[%s2759_s1 + $0x1a8] sm:$0xff]  ;;  %v111_v54 = vld [vmem:[%s2758_s0 + $0x320] sm:$0xff]  ;;  %v113_v55 = vld [vmem:[%s2758_s0 + $0x330] sm:$0xff] }
  0x4d   :  { %1374 = vmatprep.subr.bf16.mxu1 %v1373_v7  ;;  %1500 = vmatpush1.bf16.msra.mxu0 %v1499_v8  ;;  %v318_v7 = vmax.f32 %v102_v56, 0.0  ;;  %v1511_v8 = vpack.c.bf16 %v437_v59, %v435_v58  ;;  %v500_v56 = vld [vmem:[%s2759_s1 + $0x1c8] sm:$0xff]  ;;  %v328_v59 = vmax.f32 %v112_v47, 0.0  ;;  %v327_v1 = vmax.f32 %v111_v54, 0.0  ;;  %v129_v47 = vld [vmem:[%s2758_s0 + $0x3b0] sm:$0xff]  ;;  %v134_v54 = vld [vmem:[%s2758_s0 + $0x3d8] sm:$0xff] }
  0x4e   :  { %681 = vmatmul.mubr.f32.gmra.mrb[4].mxu1 %v457_v18  ;;  %1502 = vmatprep.subr.bf16.mxu0 %v1501_v13  ;;  %v1387_v13 = vpack.c.bf16 %v313_v63, %v311_v62  ;;  %v103_v18 = vld [vmem:[%s2758_s0 + $0x2e0] sm:$0xff]  ;;  %v118_v62 = vld [vmem:[%s2758_s0 + $0x358] sm:$0xff]  ;;  %v329_v2 = vmax.f32 %v113_v55, 0.0  ;;  %v128_v39 = vld [vmem:[%s2758_s0 + $0x3a8] sm:$0xff] }
  0x4f   :  { %1003 = vmatmul.mubr.f32.gmra.mrb[4].mxu0 %v461_v22  ;;  %1376 = vmatpush1.bf16.msra.mxu1 %v1375_v19  ;;  %v105_v19 = vld [vmem:[%s2758_s0 + $0x2f0] sm:$0xff]  ;;  %v490_v22 = vld [vmem:[%s2759_s1 + $0x178] sm:$0xff]  ;;  %v319_v35 = vmax.f32 %v103_v18, 0.0  ;;  %v499_v63 = vld [vmem:[%s2759_s1 + $0x1c0] sm:$0xff]  ;;  %v334_v10 = vmax.f32 %v118_v62, 0.0 }
  0x50   :  { %686 = vmatprep.mubr.f32.mxu1 %v465_v27  ;;  %1008 = vmatprep.mubr.f32.mxu0 %v469_v28  ;;  %v223_v27 = vld [vmem:[%s2758_s0 + $0x6a0] sm:$0xff]  ;;  %v225_v28 = vld [vmem:[%s2758_s0 + $0x6b0] sm:$0xff] }
  0x51   :  { %1378 = vmatprep.subr.bf16.mxu1 %v1377_v23  ;;  %1504 = vmatpush1.bf16.msra.mxu0 %v1503_v30  ;;  %v1389_v23 = vpack.c.bf16 %v318_v7, %v316_v6  ;;  %v110_v30 = vld [vmem:[%s2758_s0 + $0x318] sm:$0xff]  ;;  %v439_v31 = vmax.f32 %v223_v27, 0.0  ;;  %v441_v32 = vmax.f32 %v225_v28, 0.0  ;;  %v507_v6 = vld [vmem:[%s2759_s1 + $0x200] sm:$0xff]  ;;  %v513_v27 = vld [vmem:[%s2759_s1 + $0x230] sm:$0xff] }
  0x52   :  { %687 = vmatmul.mubr.f32.gmra.mrb[6].mxu1 %v464_v33  ;;  %1506 = vmatprep.subr.bf16.mxu0 %v1505_v36  ;;  %v485_v33 = vld [vmem:[%s2759_s1 + $0x150] sm:$0xff]  ;;  %v321_v36 = vmax.f32 %v105_v19, 0.0  ;;  %v326_v46 = vmax.f32 %v110_v30, 0.0  ;;  %v511_v7 = vld [vmem:[%s2759_s1 + $0x220] sm:$0xff] }
  0x53   :  { %1009 = vmatmul.mubr.f32.gmra.mrb[6].mxu0 %v468_v37  ;;  %1380 = vmatpush1.bf16.msra.mxu1 %v1379_v38  ;;  %v1513_v37 = vpack.c.bf16 %v442_v26, %v440_v21  ;;  %v489_v38 = vld [vmem:[%s2759_s1 + $0x170] sm:$0xff]  ;;  %v1515_v41 = vpack.c.bf16 %v441_v32, %v439_v31  ;;  %v119_v18 = vld [vmem:[%s2758_s0 + $0x360] sm:$0xff]  ;;  %v518_v21 = vld [vmem:[%s2759_s1 + $0x258] sm:$0xff] }
  0x54   :  { %692 = vmatprep.mubr.f32.mxu1 %v472_v43  ;;  %1014 = vmatprep.mubr.f32.mxu0 %v476_v48  ;;  %v497_v43 = vld [vmem:[%s2759_s1 + $0x1b0] sm:$0xff]  ;;  %v114_v48 = vld [vmem:[%s2758_s0 + $0x338] sm:$0xff]  ;;  %v1395_v50 = vpack.c.bf16 %v321_v36, %v319_v35  ;;  %v1397_v58 = vpack.c.bf16 %v326_v46, %v324_v45  ;;  %v335_v29 = vmax.f32 %v119_v18, 0.0  ;;  %v123_v32 = vld [vmem:[%s2758_s0 + $0x380] sm:$0xff] }
  0x55   :  { %1382 = vmatprep.subr.bf16.mxu1 %v1381_v49  ;;  %1508 = vmatpush1.bf16.msra.mxu0 %v1507_v52  ;;  %v492_v49 = vld [vmem:[%s2759_s1 + $0x188] sm:$0xff]  ;;  %v325_v52 = vmax.f32 %v109_v40, 0.0  ;;  %v121_v19 = vld [vmem:[%s2758_s0 + $0x370] sm:$0xff]  ;;  %v126_v26 = vld [vmem:[%s2758_s0 + $0x398] sm:$0xff] }
  0x56   :  { %693 = vmatmul.mubr.f32.gmra.mrb[8].mxu1 %v471_v60  ;;  %1510 = vmatprep.subr.bf16.mxu0 %v1509_v57  ;;  %v504_v57 = vld [vmem:[%s2759_s1 + $0x1e8] sm:$0xff]  ;;  %v330_v60 = vmax.f32 %v114_v48, 0.0  ;;  %v337_v30 = vmax.f32 %v121_v19, 0.0  ;;  %v517_v31 = vld [vmem:[%s2759_s1 + $0x250] sm:$0xff]  ;;  %v130_v40 = vld [vmem:[%s2758_s0 + $0x3b8] sm:$0xff] }
  0x57   :  { %1015 = vmatmul.mubr.f32.gmra.mrb[8].mxu0 %v475_v0  ;;  %1384 = vmatpush1.bf16.msra.mxu1 %v1383_v61  ;;  %v116_v61 = vld [vmem:[%s2758_s0 + $0x348] sm:$0xff]  ;;  %v1399_v0 = vpack.c.bf16 %v325_v52, %v323_v51  ;;  %v525_v35 = vld [vmem:[%s2759_s1 + $0x290] sm:$0xff]  ;;  %v127_v46 = vld [vmem:[%s2758_s0 + $0x3a0] sm:$0xff]  ;;  %v344_v51 = vmax.f32 %v128_v39, 0.0  ;;  %v346_v52 = vmax.f32 %v130_v40, 0.0 }
  0x58   :  { %698 = vmatprep.mubr.f32.mxu1 %v479_v3  ;;  %1020 = vmatprep.mubr.f32.mxu0 %v483_v4  ;;  %v503_v3 = vld [vmem:[%s2759_s1 + $0x1e0] sm:$0xff]  ;;  %v524_v45 = vld [vmem:[%s2759_s1 + $0x288] sm:$0xff]  ;;  %v466_v39 = vld [vmem:[%s2759_s1 + $0xb8] sm:$0xff] }
  0x59   :  { %1386 = vmatprep.subr.bf16.mxu1 %v1385_v5  ;;  %1512 = vmatpush1.bf16.msra.mxu0 %v1511_v8  ;;  %v115_v4 = vld [vmem:[%s2758_s0 + $0x340] sm:$0xff]  ;;  %v117_v5 = vld [vmem:[%s2758_s0 + $0x350] sm:$0xff]  ;;  %v1401_v8 = vpack.c.bf16 %v330_v60, %v328_v59  ;;  %v528_v48 = vld [vmem:[%s2759_s1 + $0x2a8] sm:$0xff] }
  0x5a   :  { %699 = vmatmul.mubr.f32.gmra.mrb[10].mxu1 %v478_v9  ;;  %1514 = vmatprep.subr.bf16.mxu0 %v1513_v37  ;;  %v332_v9 = vmax.f32 %v116_v61, 0.0  ;;  %v331_v15 = vmax.f32 %v115_v4, 0.0  ;;  %v333_v16 = vmax.f32 %v117_v5, 0.0  ;;  %v340_v37 = vmax.f32 %v124_v25, 0.0  ;;  %v527_v55 = vld [vmem:[%s2759_s1 + $0x2a0] sm:$0xff]  ;;  %v133_v61 = vld [vmem:[%s2758_s0 + $0x3d0] sm:$0xff] }
  0x5b   :  { %1021 = vmatmul.mubr.f32.gmra.mrb[10].mxu0 %v482_v12  ;;  %1388 = vmatpush1.bf16.msra.mxu1 %v1387_v13  ;;  %v122_v12 = vld [vmem:[%s2758_s0 + $0x378] sm:$0xff]  ;;  %v531_v59 = vld [vmem:[%s2759_s1 + $0x2c0] sm:$0xff]  ;;  %v548_v25 = vld [vmem:[%s2759_s1 + $0x348] sm:$0xff] }
  0x5c   :  { %704 = vmatprep.mubr.f32.mxu1 %v486_v14  ;;  %1026 = vmatprep.mubr.f32.mxu0 %v490_v22  ;;  %v506_v13 = vld [vmem:[%s2759_s1 + $0x1f8] sm:$0xff]  ;;  %v1403_v14 = vpack.c.bf16 %v329_v2, %v327_v1  ;;  %v1405_v22 = vpack.c.bf16 %v334_v10, %v332_v9  ;;  %v338_v24 = vmax.f32 %v122_v12, 0.0  ;;  %v1407_v28 = vpack.c.bf16 %v333_v16, %v331_v15  ;;  %v131_v60 = vld [vmem:[%s2758_s0 + $0x3c0] sm:$0xff] }
  0x5d   :  { %1390 = vmatprep.subr.bf16.mxu1 %v1389_v23  ;;  %1516 = vmatpush1.bf16.msra.mxu0 %v1515_v41  ;;  %v336_v23 = vmax.f32 %v120_v11, 0.0  ;;  %v520_v41 = vld [vmem:[%s2759_s1 + $0x268] sm:$0xff]  ;;  %v535_v62 = vld [vmem:[%s2759_s1 + $0x2e0] sm:$0xff]  ;;  %v350_v2 = vmax.f32 %v134_v54, 0.0  ;;  %v138_v4 = vld [vmem:[%s2758_s0 + $0x3f8] sm:$0xff] }
  0x5e   :  { %705 = vmatmul.mubr.f32.gmra.mrb[12].mxu1 %v485_v33  ;;  %v125_v33 = vld [vmem:[%s2758_s0 + $0x390] sm:$0xff]  ;;  %v534_v5 = vld [vmem:[%s2759_s1 + $0x2d8] sm:$0xff]  ;;  %v135_v10 = vld [vmem:[%s2758_s0 + $0x3e0] sm:$0xff]  ;;  %v354_v16 = vmax.f32 %v138_v4, 0.0 }
  0x5f   :  { %1027 = vmatmul.mubr.f32.gmra.mrb[12].mxu0 %v489_v38  ;;  %1392 = vmatpush1.bf16.msra.mxu1 %v1391_v34  ;;  %v521_v34 = vld [vmem:[%s2759_s1 + $0x270] sm:$0xff]  ;;  %v1409_v36 = vpack.c.bf16 %v338_v24, %v336_v23  ;;  %v342_v38 = vmax.f32 %v126_v26, 0.0  ;;  %v538_v9 = vld [vmem:[%s2759_s1 + $0x2f8] sm:$0xff]  ;;  %v351_v19 = vmax.f32 %v135_v10, 0.0  ;;  %v551_v10 = vld [vmem:[%s2759_s1 + $0x360] sm:$0xff] }
  0x60   :  { %710 = vmatprep.mubr.f32.mxu1 %v493_v42  ;;  %1032 = vmatprep.mubr.f32.mxu0 %v497_v43  ;;  %v1411_v42 = vpack.c.bf16 %v337_v30, %v335_v29  ;;  %v339_v43 = vmax.f32 %v123_v32, 0.0  ;;  %v137_v11 = vld [vmem:[%s2758_s0 + $0x3f0] sm:$0xff]  ;;  %v542_v12 = vld [vmem:[%s2759_s1 + $0x318] sm:$0xff]  ;;  %v1614_v30 = vmov 0.0  }
  0x61   :  { %1394 = vmatprep.subr.bf16.mxu1 %v1393_v44  ;;  %v341_v44 = vmax.f32 %v125_v33, 0.0  ;;  %v553_v23 = vld [vmem:[%s2759_s1 + $0x370] sm:$0xff]  ;;  %v452_v33 = vld [vmem:[%s2759_s1 + $0x48] sm:$0xff]  ;;  %v470_v40 = vld [vmem:[%s2759_s1 + $0xd8] sm:$0xff] }
  0x62   :  { %711 = vmatmul.mubr.f32.gmra.mrb[14].mxu1 %v492_v49  ;;  %v532_v49 = vld [vmem:[%s2759_s1 + $0x2c8] sm:$0xff]  ;;  %v445_v29 = vld [vmem:[%s2759_s1 + $0x10] sm:$0xff] }
  0x63   :  { %1033 = vmatmul.mubr.f32.gmra.mrb[14].mxu0 %v496_v53  ;;  %1396 = vmatpush1.bf16.msra.mxu1 %v1395_v50  ;;  %v1413_v50 = vpack.c.bf16 %v342_v38, %v340_v37  ;;  %v132_v53 = vld [vmem:[%s2758_s0 + $0x3c8] sm:$0xff]  ;;  %v453_v32 = vld [vmem:[%s2759_s1 + $0x50] sm:$0xff]  ;;  %v463_v37 = vld [vmem:[%s2759_s1 + $0xa0] sm:$0xff] }
  0x64   :  { %716 = vmatprep.mubr.f32.mxu1 %v500_v56  ;;  %1038 = vmatprep.mubr.f32.mxu0 %v504_v57  ;;  %v1415_v56 = vpack.c.bf16 %v341_v44, %v339_v43  ;;  %v343_v57 = vmax.f32 %v127_v46, 0.0  ;;  %v348_v1 = vmax.f32 %v132_v53, 0.0  ;;  %v467_v38 = vld [vmem:[%s2759_s1 + $0xc0] sm:$0xff]  ;;  %v477_v43 = vld [vmem:[%s2759_s1 + $0x110] sm:$0xff]  ;;  %v484_v46 = vld [vmem:[%s2759_s1 + $0x148] sm:$0xff] }
  0x65   :  { %1398 = vmatprep.subr.bf16.mxu1 %v1397_v58  ;;  %v345_v58 = vmax.f32 %v129_v47, 0.0  ;;  %v481_v44 = vld [vmem:[%s2759_s1 + $0x130] sm:$0xff]  ;;  %v488_v47 = vld [vmem:[%s2759_s1 + $0x168] sm:$0xff]  ;;  %v502_v53 = vld [vmem:[%s2759_s1 + $0x1d8] sm:$0xff] }
  0x66   :  { %717 = vmatmul.mubr.f32.gmra.mrb[16].mxu1 %v499_v63  ;;  %v539_v63 = vld [vmem:[%s2759_s1 + $0x300] sm:$0xff]  ;;  %v501_v54 = vld [vmem:[%s2759_s1 + $0x1d0] sm:$0xff] }
  0x67   :  { %1039 = vmatmul.mubr.f32.gmra.mrb[16].mxu0 %v503_v3  ;;  %1400 = vmatpush1.bf16.msra.mxu1 %v1399_v0  ;;  %v1417_v0 = vpack.c.bf16 %v346_v52, %v344_v51  ;;  %v136_v3 = vld [vmem:[%s2758_s0 + $0x3e8] sm:$0xff]  ;;  %v494_v51 = vld [vmem:[%s2759_s1 + $0x198] sm:$0xff]  ;;  %v537_v4 = vld [vmem:[%s2759_s1 + $0x2f0] sm:$0xff] }
  0x68   :  { %722 = vmatprep.mubr.f32.mxu1 %v507_v6  ;;  %1044 = vmatprep.mubr.f32.mxu0 %v511_v7  ;;  %v1419_v6 = vpack.c.bf16 %v345_v58, %v343_v57  ;;  %v347_v7 = vmax.f32 %v131_v60, 0.0  ;;  %v352_v15 = vmax.f32 %v136_v3, 0.0  ;;  %v498_v52 = vld [vmem:[%s2759_s1 + $0x1b8] sm:$0xff]  ;;  %v508_v57 = vld [vmem:[%s2759_s1 + $0x208] sm:$0xff]  ;;  %v515_v60 = vld [vmem:[%s2759_s1 + $0x240] sm:$0xff] }
  0x69   :  { %1402 = vmatprep.subr.bf16.mxu1 %v1401_v8  ;;  %v349_v8 = vmax.f32 %v133_v61, 0.0  ;;  %v512_v58 = vld [vmem:[%s2759_s1 + $0x228] sm:$0xff]  ;;  %v519_v61 = vld [vmem:[%s2759_s1 + $0x260] sm:$0xff]  ;;  %v533_v3 = vld [vmem:[%s2759_s1 + $0x2d0] sm:$0xff] }
  0x6a   :  { %723 = vmatmul.mubr.f32.gmra.mrb[18].mxu1 %v506_v13  ;;  %v546_v13 = vld [vmem:[%s2759_s1 + $0x338] sm:$0xff]  ;;  %v1425_v24 = vpack.c.bf16 %v354_v16, %v352_v15 }
  0x6b   :  { %1045 = vmatmul.mubr.f32.gmra.mrb[18].mxu0 %v510_v17  ;;  %1404 = vmatpush1.bf16.msra.mxu1 %v1403_v14  ;;  %v1421_v14 = vpack.c.bf16 %v350_v2, %v348_v1  ;;  %v541_v17 = vld [vmem:[%s2759_s1 + $0x310] sm:$0xff]  ;;  %v1423_v18 = vpack.c.bf16 %v349_v8, %v347_v7  ;;  %v530_v1 = vld [vmem:[%s2759_s1 + $0x2b8] sm:$0xff]  ;;  %v544_v7 = vld [vmem:[%s2759_s1 + $0x328] sm:$0xff] }
  0x6c   :  { %728 = vmatprep.mubr.f32.mxu1 %v514_v20  ;;  %1050 = vmatprep.mubr.f32.mxu0 %v518_v21  ;;  %v353_v20 = vmax.f32 %v137_v11, 0.0  ;;  %v545_v21 = vld [vmem:[%s2759_s1 + $0x330] sm:$0xff]  ;;  %v543_v8 = vld [vmem:[%s2759_s1 + $0x320] sm:$0xff]  ;;  %v550_v11 = vld [vmem:[%s2759_s1 + $0x358] sm:$0xff] }
  0x6d   :  { %1406 = vmatprep.subr.bf16.mxu1 %v1405_v22  ;;  %v549_v22 = vld [vmem:[%s2759_s1 + $0x350] sm:$0xff] }
  0x6e   :  { %729 = vmatmul.mubr.f32.gmra.mrb[20].mxu1 %v513_v27  ;;  %v1427_v26 = vpack.c.bf16 %v353_v20, %v351_v19  ;;  %v552_v27 = vld [vmem:[%s2759_s1 + $0x368] sm:$0xff]  ;;  %v529_v2 = vld [vmem:[%s2759_s1 + $0x2b0] sm:$0xff] }
  0x6f   :  { %1051 = vmatmul.mubr.f32.gmra.mrb[20].mxu0 %v517_v31  ;;  %1408 = vmatpush1.bf16.msra.mxu1 %v1407_v28  ;;  %v446_v28 = vld [vmem:[%s2759_s1 + $0x18] sm:$0xff]  ;;  %v449_v31 = vld [vmem:[%s2759_s1 + $0x30] sm:$0xff] }
  0x70   :  { %734 = vmatprep.mubr.f32.mxu1 %v521_v34  ;;  %1056 = vmatprep.mubr.f32.mxu0 %v525_v35  ;;  %v456_v34 = vld [vmem:[%s2759_s1 + $0x68] sm:$0xff] }
  0x71   :  { %1410 = vmatprep.subr.bf16.mxu1 %v1409_v36  ;;  %v460_v35 = vld [vmem:[%s2759_s1 + $0x88] sm:$0xff]  ;;  %v459_v36 = vld [vmem:[%s2759_s1 + $0x80] sm:$0xff] }
  0x72   :  { %735 = vmatmul.mubr.f32.gmra.mrb[22].mxu1 %v520_v41  ;;  %v474_v41 = vld [vmem:[%s2759_s1 + $0xf8] sm:$0xff] }
  0x73   :  { %1057 = vmatmul.mubr.f32.gmra.mrb[22].mxu0 %v524_v45  ;;  %1412 = vmatpush1.bf16.msra.mxu1 %v1411_v42  ;;  %v473_v42 = vld [vmem:[%s2759_s1 + $0xf0] sm:$0xff]  ;;  %v480_v45 = vld [vmem:[%s2759_s1 + $0x128] sm:$0xff] }
  0x74   :  { %740 = vmatprep.mubr.f32.mxu1 %v528_v48  ;;  %1062 = vmatprep.mubr.f32.mxu0 %v532_v49  ;;  %v487_v48 = vld [vmem:[%s2759_s1 + $0x160] sm:$0xff] }
  0x75   :  { %1414 = vmatprep.subr.bf16.mxu1 %v1413_v50  ;;  %v491_v49 = vld [vmem:[%s2759_s1 + $0x180] sm:$0xff] }
  0x76   :  { %741 = vmatmul.mubr.f32.gmra.mrb[24].mxu1 %v527_v55  ;;  %v495_v50 = vld [vmem:[%s2759_s1 + $0x1a0] sm:$0xff]  ;;  %v505_v55 = vld [vmem:[%s2759_s1 + $0x1f0] sm:$0xff] }
  0x77   :  { %1063 = vmatmul.mubr.f32.gmra.mrb[24].mxu0 %v531_v59  ;;  %1416 = vmatpush1.bf16.msra.mxu1 %v1415_v56  ;;  %v509_v56 = vld [vmem:[%s2759_s1 + $0x210] sm:$0xff]  ;;  %v516_v59 = vld [vmem:[%s2759_s1 + $0x248] sm:$0xff] }
  0x78   :  { %746 = vmatprep.mubr.f32.mxu1 %v535_v62  ;;  %1068 = vmatprep.mubr.f32.mxu0 %v539_v63  ;;  %v523_v62 = vld [vmem:[%s2759_s1 + $0x280] sm:$0xff]  ;;  %v522_v63 = vld [vmem:[%s2759_s1 + $0x278] sm:$0xff] }
  0x79   :  { %1418 = vmatprep.subr.bf16.mxu1 %v1417_v0  ;;  %v526_v0 = vld [vmem:[%s2759_s1 + $0x298] sm:$0xff] }
  0x7a   :  { %747 = vmatmul.mubr.f32.gmra.mrb[26].mxu1 %v534_v5  ;;  %v536_v5 = vld [vmem:[%s2759_s1 + $0x2e8] sm:$0xff] }
  0x7b   :  { %1069 = vmatmul.mubr.f32.gmra.mrb[26].mxu0 %v538_v9  ;;  %1420 = vmatpush1.bf16.msra.mxu1 %v1419_v6  ;;  %v540_v6 = vld [vmem:[%s2759_s1 + $0x308] sm:$0xff]  ;;  %v547_v9 = vld [vmem:[%s2759_s1 + $0x340] sm:$0xff] }
  0x7c   :  { %752 = vmatprep.mubr.f32.mxu1 %v542_v12  ;;  %1074 = vmatprep.mubr.f32.mxu0 %v546_v13  ;;  %v554_v12 = vld [vmem:[%s2759_s1 + $0x378] sm:$0xff] }
  0x7d   :  { %1422 = vmatprep.subr.bf16.mxu1 %v1421_v14 }
  0x7e   :  { %753 = vmatmul.mubr.f32.gmra.mrb[28].mxu1 %v541_v17 }
  0x7f   :  { %1075 = vmatmul.mubr.f32.gmra.mrb[28].mxu0 %v545_v21  ;;  %1424 = vmatpush1.bf16.msra.mxu1 %v1423_v18 }
  0x80   :  { %758 = vmatprep.mubr.f32.mxu1 %v549_v22  ;;  %1080 = vmatprep.mubr.f32.mxu0 %v553_v23 }
  0x81   :  { %1426 = vmatprep.subr.bf16.mxu1 %v1425_v24 }
  0x82   :  { %759 = vmatmul.mubr.f32.gmra.mrb[30].mxu1 %v548_v25 }
  0x83   :  { %1081 = vmatmul.mubr.f32.gmra.mrb[30].mxu0 %v552_v27  ;;  %1428 = vmatpush1.bf16.msra.mxu1 %v1427_v26 }
  0x84   :  { %829 = vmatprep.mubr.f32.mxu1 %v446_v28  ;;  %1151 = vmatprep.mubr.f32.mxu0 %v1614_v30 }
  0x86   :  { %830 = vmatmul.mubr.f32.vlgmr.msra.gmra.mrb[0].mxu1 %v445_v29 }
  0x87   :  { %1285 = vmatmul.mubr.msk.f32.vlgmr.msra.gmra.mrb[0].mxu0 %vm555_vm0, %v449_v31  ;;  %835 = vmatprep.mubr.f32.mxu1 %v453_v32 }
  0x88   :  { %1157 = vmatprep.mubr.f32.mxu0 %v1614_v30 }
  0x8a   :  { %836 = vmatmul.mubr.f32.gmra.mrb[2].mxu1 %v452_v33 }
  0x8b   :  { %1286 = vmatmul.mubr.msk.f32.gmra.mrb[2].mxu0 %vm555_vm0, %v456_v34  ;;  %841 = vmatprep.mubr.f32.mxu1 %v460_v35 }
  0x8c   :  { %1163 = vmatprep.mubr.f32.mxu0 %v1614_v30 }
  0x8e   :  { %842 = vmatmul.mubr.f32.gmra.mrb[4].mxu1 %v459_v36 }
  0x8f   :  { %1287 = vmatmul.mubr.msk.f32.gmra.mrb[4].mxu0 %vm555_vm0, %v463_v37  ;;  %847 = vmatprep.mubr.f32.mxu1 %v467_v38 }
  0x90   :  { %1169 = vmatprep.mubr.f32.mxu0 %v1614_v30 }
  0x92   :  { %848 = vmatmul.mubr.f32.gmra.mrb[6].mxu1 %v466_v39 }
  0x93   :  { %1288 = vmatmul.mubr.msk.f32.gmra.mrb[6].mxu0 %vm555_vm0, %v470_v40  ;;  %853 = vmatprep.mubr.f32.mxu1 %v474_v41 }
  0x94   :  { %1175 = vmatprep.mubr.f32.mxu0 %v1614_v30 }
  0x96   :  { %854 = vmatmul.mubr.f32.gmra.mrb[8].mxu1 %v473_v42 }
  0x97   :  { %1289 = vmatmul.mubr.msk.f32.gmra.mrb[8].mxu0 %vm555_vm0, %v477_v43  ;;  %859 = vmatprep.mubr.f32.mxu1 %v481_v44 }
  0x98   :  { %1181 = vmatprep.mubr.f32.mxu0 %v1614_v30 }
  0x9a   :  { %860 = vmatmul.mubr.f32.gmra.mrb[10].mxu1 %v480_v45 }
  0x9b   :  { %1290 = vmatmul.mubr.msk.f32.gmra.mrb[10].mxu0 %vm555_vm0, %v484_v46  ;;  %865 = vmatprep.mubr.f32.mxu1 %v488_v47 }
  0x9c   :  { %1187 = vmatprep.mubr.f32.mxu0 %v1614_v30 }
  0x9e   :  { %866 = vmatmul.mubr.f32.gmra.mrb[12].mxu1 %v487_v48 }
  0x9f   :  { %1291 = vmatmul.mubr.msk.f32.gmra.mrb[12].mxu0 %vm555_vm0, %v491_v49  ;;  %871 = vmatprep.mubr.f32.mxu1 %v495_v50 }
  0xa0   :  { %1193 = vmatprep.mubr.f32.mxu0 %v1614_v30 }
  0xa2   :  { %872 = vmatmul.mubr.f32.gmra.mrb[14].mxu1 %v494_v51 }
  0xa3   :  { %1292 = vmatmul.mubr.msk.f32.gmra.mrb[14].mxu0 %vm555_vm0, %v498_v52  ;;  %877 = vmatprep.mubr.f32.mxu1 %v502_v53 }
  0xa4   :  { %1199 = vmatprep.mubr.f32.mxu0 %v1614_v30 }
  0xa6   :  { %878 = vmatmul.mubr.f32.gmra.mrb[16].mxu1 %v501_v54 }
  0xa7   :  { %1293 = vmatmul.mubr.msk.f32.gmra.mrb[16].mxu0 %vm555_vm0, %v505_v55  ;;  %883 = vmatprep.mubr.f32.mxu1 %v509_v56 }
  0xa8   :  { %1205 = vmatprep.mubr.f32.mxu0 %v1614_v30 }
  0xaa   :  { %884 = vmatmul.mubr.f32.gmra.mrb[18].mxu1 %v508_v57 }
  0xab   :  { %1294 = vmatmul.mubr.msk.f32.gmra.mrb[18].mxu0 %vm555_vm0, %v512_v58  ;;  %889 = vmatprep.mubr.f32.mxu1 %v516_v59 }
  0xac   :  { %1211 = vmatprep.mubr.f32.mxu0 %v1614_v30 }
  0xae   :  { %890 = vmatmul.mubr.f32.gmra.mrb[20].mxu1 %v515_v60 }
  0xaf   :  { %1295 = vmatmul.mubr.msk.f32.gmra.mrb[20].mxu0 %vm555_vm0, %v519_v61  ;;  %895 = vmatprep.mubr.f32.mxu1 %v523_v62 }
  0xb0   :  { %1217 = vmatprep.mubr.f32.mxu0 %v1614_v30 }
  0xb2   :  { %896 = vmatmul.mubr.f32.gmra.mrb[22].mxu1 %v522_v63 }
  0xb3   :  { %1296 = vmatmul.mubr.msk.f32.gmra.mrb[22].mxu0 %vm555_vm0, %v526_v0  ;;  %901 = vmatprep.mubr.f32.mxu1 %v530_v1 }
  0xb4   :  { %1223 = vmatprep.mubr.f32.mxu0 %v1614_v30 }
  0xb6   :  { %902 = vmatmul.mubr.f32.gmra.mrb[24].mxu1 %v529_v2 }
  0xb7   :  { %1297 = vmatmul.mubr.msk.f32.gmra.mrb[24].mxu0 %vm555_vm0, %v533_v3  ;;  %907 = vmatprep.mubr.f32.mxu1 %v537_v4 }
  0xb8   :  { %1229 = vmatprep.mubr.f32.mxu0 %v1614_v30 }
  0xba   :  { %908 = vmatmul.mubr.f32.gmra.mrb[26].mxu1 %v536_v5 }
  0xbb   :  { %1298 = vmatmul.mubr.msk.f32.gmra.mrb[26].mxu0 %vm555_vm0, %v540_v6  ;;  %913 = vmatprep.mubr.f32.mxu1 %v544_v7 }
  0xbc   :  { %1235 = vmatprep.mubr.f32.mxu0 %v1614_v30 }
  0xbe   :  { %914 = vmatmul.mubr.f32.gmra.mrb[28].mxu1 %v543_v8 }
  0xbf   :  { %1299 = vmatmul.mubr.msk.f32.gmra.mrb[28].mxu0 %vm555_vm0, %v547_v9  ;;  %919 = vmatprep.mubr.f32.mxu1 %v551_v10 }
  0xc0   :  { %1241 = vmatprep.mubr.f32.mxu0 %v1614_v30 }
  0xc2   :  { %920 = vmatmul.mubr.f32.gmra.mrb[30].mxu1 %v550_v11 }
  0xc3   :  { %1300 = vmatmul.mubr.msk.f32.gmra.mrb[30].mxu0 %vm555_vm0, %v554_v12 }
 0x159   :  { %v831_v13 = vpop.f32.mrb[0].mxu1 }
 0x15a   :  { %v1153_v14 = vpop.f32.mrb[0].mxu0  ;;  %v833_v15 = vpop.f32.mrb[1].mxu1 }
 0x15b   :  { %v1517_v16 = vadd.f32 %v1153_v14, %v831_v13  ;;  %v1155_v17 = vpop.f32.mrb[1].mxu0 }
 0x15c   :  { %v1518_v18 = vadd.f32 %v1155_v17, %v833_v15 }
 0x15d   :  { %1248 = vst [vmem:[%s2760_s2] sm:$0xff] %v1517_v16  ;;  %v837_v19 = vpop.f32.mrb[2].mxu1 }
 0x15e   :  { %1250 = vst.msk [vmem:[%s2760_s2 + $0x8] sm:$0xff] %vm1249_vm1, %v1518_v18  ;;  %v1159_v20 = vpop.f32.mrb[2].mxu0  ;;  %v839_v21 = vpop.f32.mrb[3].mxu1 }
 0x15f   :  { %v1519_v22 = vadd.f32 %v1159_v20, %v837_v19  ;;  %v1161_v23 = vpop.f32.mrb[3].mxu0 }
 0x160   :  { %v1520_v24 = vadd.f32 %v1161_v23, %v839_v21 }
 0x161   :  { %1251 = vst [vmem:[%s2760_s2 + $0x10] sm:$0xff] %v1519_v22  ;;  %v843_v25 = vpop.f32.mrb[4].mxu1 }
 0x162   :  { %1252 = vst.msk [vmem:[%s2760_s2 + $0x18] sm:$0xff] %vm1249_vm1, %v1520_v24  ;;  %v1165_v26 = vpop.f32.mrb[4].mxu0  ;;  %v845_v27 = vpop.f32.mrb[5].mxu1 }
 0x163   :  { %v1521_v28 = vadd.f32 %v1165_v26, %v843_v25  ;;  %v1167_v29 = vpop.f32.mrb[5].mxu0 }
 0x164   :  { %v1522_v30 = vadd.f32 %v1167_v29, %v845_v27 }
 0x165   :  { %1253 = vst [vmem:[%s2760_s2 + $0x20] sm:$0xff] %v1521_v28  ;;  %v849_v31 = vpop.f32.mrb[6].mxu1 }
 0x166   :  { %1254 = vst.msk [vmem:[%s2760_s2 + $0x28] sm:$0xff] %vm1249_vm1, %v1522_v30  ;;  %v1171_v32 = vpop.f32.mrb[6].mxu0  ;;  %v851_v33 = vpop.f32.mrb[7].mxu1 }
 0x167   :  { %v1523_v34 = vadd.f32 %v1171_v32, %v849_v31  ;;  %v1173_v35 = vpop.f32.mrb[7].mxu0 }
 0x168   :  { %v1524_v36 = vadd.f32 %v1173_v35, %v851_v33 }
 0x169   :  { %1255 = vst [vmem:[%s2760_s2 + $0x30] sm:$0xff] %v1523_v34  ;;  %v855_v37 = vpop.f32.mrb[8].mxu1 }
 0x16a   :  { %1256 = vst.msk [vmem:[%s2760_s2 + $0x38] sm:$0xff] %vm1249_vm1, %v1524_v36  ;;  %v1177_v38 = vpop.f32.mrb[8].mxu0  ;;  %v857_v39 = vpop.f32.mrb[9].mxu1 }
 0x16b   :  { %v1525_v40 = vadd.f32 %v1177_v38, %v855_v37  ;;  %v1179_v41 = vpop.f32.mrb[9].mxu0 }
 0x16c   :  { %v1526_v42 = vadd.f32 %v1179_v41, %v857_v39 }
 0x16d   :  { %1257 = vst [vmem:[%s2760_s2 + $0x40] sm:$0xff] %v1525_v40  ;;  %v861_v43 = vpop.f32.mrb[10].mxu1 }
 0x16e   :  { %1258 = vst.msk [vmem:[%s2760_s2 + $0x48] sm:$0xff] %vm1249_vm1, %v1526_v42  ;;  %v1183_v44 = vpop.f32.mrb[10].mxu0  ;;  %v863_v45 = vpop.f32.mrb[11].mxu1 }
 0x16f   :  { %v1527_v46 = vadd.f32 %v1183_v44, %v861_v43  ;;  %v1185_v47 = vpop.f32.mrb[11].mxu0 }
 0x170   :  { %v1528_v48 = vadd.f32 %v1185_v47, %v863_v45 }
 0x171   :  { %1259 = vst [vmem:[%s2760_s2 + $0x50] sm:$0xff] %v1527_v46  ;;  %v867_v49 = vpop.f32.mrb[12].mxu1 }
 0x172   :  { %1260 = vst.msk [vmem:[%s2760_s2 + $0x58] sm:$0xff] %vm1249_vm1, %v1528_v48  ;;  %v1189_v50 = vpop.f32.mrb[12].mxu0  ;;  %v869_v51 = vpop.f32.mrb[13].mxu1 }
 0x173   :  { %v1529_v52 = vadd.f32 %v1189_v50, %v867_v49  ;;  %v1191_v53 = vpop.f32.mrb[13].mxu0 }
 0x174   :  { %v1530_v54 = vadd.f32 %v1191_v53, %v869_v51 }
 0x175   :  { %1261 = vst [vmem:[%s2760_s2 + $0x60] sm:$0xff] %v1529_v52  ;;  %v873_v55 = vpop.f32.mrb[14].mxu1 }
 0x176   :  { %1262 = vst.msk [vmem:[%s2760_s2 + $0x68] sm:$0xff] %vm1249_vm1, %v1530_v54  ;;  %v1195_v56 = vpop.f32.mrb[14].mxu0  ;;  %v875_v57 = vpop.f32.mrb[15].mxu1 }
 0x177   :  { %v1531_v58 = vadd.f32 %v1195_v56, %v873_v55  ;;  %v1197_v59 = vpop.f32.mrb[15].mxu0 }
 0x178   :  { %v1532_v60 = vadd.f32 %v1197_v59, %v875_v57 }
 0x179   :  { %1263 = vst [vmem:[%s2760_s2 + $0x70] sm:$0xff] %v1531_v58  ;;  %v879_v61 = vpop.f32.mrb[16].mxu1 }
 0x17a   :  { %1264 = vst.msk [vmem:[%s2760_s2 + $0x78] sm:$0xff] %vm1249_vm1, %v1532_v60  ;;  %v1201_v62 = vpop.f32.mrb[16].mxu0  ;;  %v881_v63 = vpop.f32.mrb[17].mxu1 }
 0x17b   :  { %v1533_v0 = vadd.f32 %v1201_v62, %v879_v61  ;;  %v1203_v1 = vpop.f32.mrb[17].mxu0 }
 0x17c   :  { %v1534_v2 = vadd.f32 %v1203_v1, %v881_v63 }
 0x17d   :  { %1265 = vst [vmem:[%s2760_s2 + $0x80] sm:$0xff] %v1533_v0  ;;  %v885_v3 = vpop.f32.mrb[18].mxu1 }
 0x17e   :  { %1266 = vst.msk [vmem:[%s2760_s2 + $0x88] sm:$0xff] %vm1249_vm1, %v1534_v2  ;;  %v1207_v4 = vpop.f32.mrb[18].mxu0  ;;  %v887_v5 = vpop.f32.mrb[19].mxu1 }
 0x17f   :  { %v1535_v6 = vadd.f32 %v1207_v4, %v885_v3  ;;  %v1209_v7 = vpop.f32.mrb[19].mxu0 }
 0x180   :  { %v1536_v8 = vadd.f32 %v1209_v7, %v887_v5 }
 0x181   :  { %1267 = vst [vmem:[%s2760_s2 + $0x90] sm:$0xff] %v1535_v6  ;;  %v891_v9 = vpop.f32.mrb[20].mxu1 }
 0x182   :  { %1268 = vst.msk [vmem:[%s2760_s2 + $0x98] sm:$0xff] %vm1249_vm1, %v1536_v8  ;;  %v1213_v10 = vpop.f32.mrb[20].mxu0  ;;  %v893_v11 = vpop.f32.mrb[21].mxu1 }
 0x183   :  { %v1537_v12 = vadd.f32 %v1213_v10, %v891_v9  ;;  %v1215_v13 = vpop.f32.mrb[21].mxu0 }
 0x184   :  { %v1538_v14 = vadd.f32 %v1215_v13, %v893_v11 }
 0x185   :  { %1269 = vst [vmem:[%s2760_s2 + $0xa0] sm:$0xff] %v1537_v12  ;;  %v897_v15 = vpop.f32.mrb[22].mxu1 }
 0x186   :  { %1270 = vst.msk [vmem:[%s2760_s2 + $0xa8] sm:$0xff] %vm1249_vm1, %v1538_v14  ;;  %v1219_v16 = vpop.f32.mrb[22].mxu0  ;;  %v899_v17 = vpop.f32.mrb[23].mxu1 }
 0x187   :  { %v1539_v18 = vadd.f32 %v1219_v16, %v897_v15  ;;  %v1221_v19 = vpop.f32.mrb[23].mxu0 }
 0x188   :  { %v1540_v20 = vadd.f32 %v1221_v19, %v899_v17 }
 0x189   :  { %1271 = vst [vmem:[%s2760_s2 + $0xb0] sm:$0xff] %v1539_v18  ;;  %v903_v21 = vpop.f32.mrb[24].mxu1 }
 0x18a   :  { %1272 = vst.msk [vmem:[%s2760_s2 + $0xb8] sm:$0xff] %vm1249_vm1, %v1540_v20  ;;  %v1225_v22 = vpop.f32.mrb[24].mxu0  ;;  %v905_v23 = vpop.f32.mrb[25].mxu1 }
 0x18b   :  { %v1541_v24 = vadd.f32 %v1225_v22, %v903_v21  ;;  %v1227_v25 = vpop.f32.mrb[25].mxu0 }
 0x18c   :  { %v1542_v26 = vadd.f32 %v1227_v25, %v905_v23 }
 0x18d   :  { %1273 = vst [vmem:[%s2760_s2 + $0xc0] sm:$0xff] %v1541_v24  ;;  %v909_v27 = vpop.f32.mrb[26].mxu1 }
 0x18e   :  { %1274 = vst.msk [vmem:[%s2760_s2 + $0xc8] sm:$0xff] %vm1249_vm1, %v1542_v26  ;;  %v1231_v28 = vpop.f32.mrb[26].mxu0  ;;  %v911_v29 = vpop.f32.mrb[27].mxu1 }
 0x18f   :  { %v1543_v30 = vadd.f32 %v1231_v28, %v909_v27  ;;  %v1233_v31 = vpop.f32.mrb[27].mxu0 }
 0x190   :  { %v1544_v32 = vadd.f32 %v1233_v31, %v911_v29 }
 0x191   :  { %1275 = vst [vmem:[%s2760_s2 + $0xd0] sm:$0xff] %v1543_v30  ;;  %v915_v33 = vpop.f32.mrb[28].mxu1 }
 0x192   :  { %1276 = vst.msk [vmem:[%s2760_s2 + $0xd8] sm:$0xff] %vm1249_vm1, %v1544_v32  ;;  %v1237_v34 = vpop.f32.mrb[28].mxu0  ;;  %v917_v35 = vpop.f32.mrb[29].mxu1 }
 0x193   :  { %v1545_v36 = vadd.f32 %v1237_v34, %v915_v33  ;;  %v1239_v37 = vpop.f32.mrb[29].mxu0 }
 0x194   :  { %v1546_v38 = vadd.f32 %v1239_v37, %v917_v35 }
 0x195   :  { %1277 = vst [vmem:[%s2760_s2 + $0xe0] sm:$0xff] %v1545_v36  ;;  %v921_v39 = vpop.f32.mrb[30].mxu1 }
 0x196   :  { %1278 = vst.msk [vmem:[%s2760_s2 + $0xe8] sm:$0xff] %vm1249_vm1, %v1546_v38  ;;  %v1243_v40 = vpop.f32.mrb[30].mxu0  ;;  %v923_v41 = vpop.f32.mrb[31].mxu1 }
 0x197   :  { %v1547_v42 = vadd.f32 %v1243_v40, %v921_v39  ;;  %v1245_v43 = vpop.f32.mrb[31].mxu0 }
 0x198   :  { %v1548_v44 = vadd.f32 %v1245_v43, %v923_v41 }
 0x199   :  { %1279 = vst [vmem:[%s2760_s2 + $0xf0] sm:$0xff] %v1547_v42 }
 0x19a   :  { %1280 = vst.msk [vmem:[%s2760_s2 + $0xf8] sm:$0xff] %vm1249_vm1, %v1548_v44 }

</bundles_post_ra>
